<compile_context>
chip_gen: v7x
topology: tpu7x:2x2x1
jax: 0.10.0
libtpu: 0.0.40
codegen_flags: <defaults>
</compile_context>

<pallas_src>
import math

import jax
import jax.numpy as jnp
from jax import lax
from jax.experimental import pallas as pl
from jax.experimental.pallas import tpu as pltpu

# ---------------- config (mirrors the TrainingConfig fields the forward uses) --------
BATCH = 2
SEQ = 8
MODEL_DIM = 32
N_Q_HEADS = 4
N_KV_HEADS = 2
HEAD_DIM = MODEL_DIM // N_Q_HEADS            # 8
KV_DIM = N_KV_HEADS * HEAD_DIM               # 16
HD = N_Q_HEADS * HEAD_DIM                    # 32  width of q / GQA-expanded k,v
N_LAYERS = 2
VOCAB = 64
VOCAB_PAD = 128                              # lane-dense padded LM-head width
ROPE_THETA = 10000.0
RMS_EPS = float(jnp.finfo(jnp.float32).eps)  # torch.nn.RMSNorm(eps=None) default (f32)
FFN_GATE = 2 * MODEL_DIM                     # 64
FFN_HIDDEN = 4 * MODEL_DIM                   # 128
ROWS = BATCH * SEQ                           # 16  batch collapsed into the row dim
HBS = N_Q_HEADS * ROWS                       # 64  lane-concatenated (head, batch, key) width


# ---------------------------- in-kernel helpers --------------------------------------
def _rmsnorm(x, g):
    ms = jnp.mean(x * x, axis=-1, keepdims=True)
    return x * lax.rsqrt(ms + RMS_EPS) * g


def _bf16(x):
    return x.astype(jnp.bfloat16)


# ---------------------------- fully fused forward kernel -----------------------------
def fused_forward_kernel(
    x_ref,        # (R, D)          f32  activations, batch folded into rows (R = B*S)
    wproj_ref,    # (L, D, 5*HD)    bf16 [wq*s | wk_exp | wv_exp | (wq*s)P | wk_exp P]
    wo_ref,       # (L, HD, D)      bf16
    wffn_ref,     # (L, D, 6*D)     bf16 [w1_x | w1_gate | w2]
    w3_ref,       # (L, 2*D, D)     bf16
    gatt_ref,     # (L, 1, D)       f32
    gffn_ref,     # (L, 1, D)       f32
    cos_ref,      # (R, HD)         f32  per-row RoPE cos (position = row % S)
    sin_ref,      # (R, HD)         f32  sign pattern [-1,+1,...] folded in
    gfin_ref,     # (1, D)          f32
    wout_ref,     # (D, VOCAB_PAD)  bf16 tied head, transposed + zero-padded at pack time
    ncmask_ref,   # (R, HBS)        f32  additive mask: 0 allowed, -1e30 masked
    hmask_ref,    # (HBS, HD)       bf16 head-block mask for the K/V slabs
    o_ref,        # (R, VOCAB_PAD)  f32
):
    x = x_ref[...]                                              # (R, D) f32
    cos = cos_ref[...]
    sin = sin_ref[...]
    neg_causal = ncmask_ref[...]                                # (R, HBS) f32
    head_mask = hmask_ref[...]                                  # (HBS, HD) bf16

    for l in range(N_LAYERS):                                   # static unroll (L=2)
        # -------- attention sub-layer: x + Wo @ attn(rmsnorm(x)) --------
        h = _rmsnorm(x, gatt_ref[l])                            # f32
        # single fused projection matmul (q, k, v and their RoPE pair-swapped copies)
        proj = jnp.dot(_bf16(h), wproj_ref[l],
                       preferred_element_type=jnp.float32)      # (R, 5*HD) f32
        q = proj[:, 0 * HD:1 * HD]
        k = proj[:, 1 * HD:2 * HD]
        v = proj[:, 2 * HD:3 * HD]
        q_sw = proj[:, 3 * HD:4 * HD]
        k_sw = proj[:, 4 * HD:5 * HD]
        # RoPE (interleaved complex convention); pair-swap / GQA expansion / qk-scale are
        # folded into wproj columns, so this is pure element-wise f32 work.
        q = q * cos + q_sw * sin
        k = k * cos + k_sw * sin

        # Head-block-diagonal K / V slabs: slab row block h keeps only head h's columns.
        k_big = _bf16(jnp.concatenate([k] * N_Q_HEADS, axis=0)) * head_mask   # (HBS, HD)
        v_big = _bf16(jnp.concatenate([v] * N_Q_HEADS, axis=0)) * head_mask   # (HBS, HD)

        # all-head scores in one matmul; column = head*R + (batch*S + key_pos)
        s = lax.dot_general(_bf16(q), k_big, (((1,), (1,)), ((), ())),
                            preferred_element_type=jnp.float32)  # (R, HBS) f32
        s = s + neg_causal                                       # causal + batch-block mask

        # per-head stabilized softmax (f32), static loop over the 4 query heads
        p_parts = []
        for hh in range(N_Q_HEADS):
            sh = s[:, hh * ROWS:(hh + 1) * ROWS]                 # (R, R)
            mh = jnp.max(sh, axis=-1, keepdims=True)             # per-head max (no underflow)
            ph = jnp.exp(sh - mh)
            dh = jnp.sum(ph, axis=-1, keepdims=True)             # >= 1 always
            p_parts.append(ph * pl.reciprocal(dh, approx=True))  # EUP reciprocal (free slot)
        p = jnp.concatenate(p_parts, axis=-1)                    # (R, HBS) f32

        attn = jnp.dot(_bf16(p), v_big,
                       preferred_element_type=jnp.float32)       # (R, HD), heads concat'd
        x = x + jnp.dot(_bf16(attn), wo_ref[l],
                        preferred_element_type=jnp.float32)

        # -------- feed-forward sub-layer: x + W3(SwiGLU(W1 h) * (W2 h)) --------
        h2 = _rmsnorm(x, gffn_ref[l])
        f = jnp.dot(_bf16(h2), wffn_ref[l],
                    preferred_element_type=jnp.float32)          # (R, 6*D) f32
        a_x = f[:, :FFN_GATE]
        a_g = f[:, FFN_GATE:FFN_HIDDEN]
        b = f[:, FFN_HIDDEN:]
        sw = a_x * (a_g * jax.nn.sigmoid(a_g))                   # SwiGLU (f32)
        x = x + jnp.dot(_bf16(sw * b), w3_ref[l],
                        preferred_element_type=jnp.float32)

    # -------- final RMSNorm + tied LM head (lane-padded to 128) --------
    hf = _rmsnorm(x, gfin_ref[...])
    o_ref[...] = jnp.dot(_bf16(hf), wout_ref[...],
                         preferred_element_type=jnp.float32).astype(o_ref.dtype)


# ---------------------------- wrapper --------------------------------------------------
_VMEM_SPEC = pl.BlockSpec(memory_space=pltpu.MemorySpace.VMEM)


def dumble_llm_forward(tokens, packed):
    (w_emb, wproj, wo, wffn, w3, gatt, gffn, cos, sin, gfin, wout_pad,
     neg_causal, head_mask) = packed

    # Embedding lookup is a gather -> plain JAX glue.
    x = jnp.take(w_emb, tokens, axis=0).astype(jnp.float32)      # (B, S, D)
    B, S, D = x.shape
    x2 = x.reshape(B * S, D)                                     # batch collapsed into rows

    logits_pad = pl.pallas_call(
        fused_forward_kernel,
        out_shape=jax.ShapeDtypeStruct((B * S, VOCAB_PAD), jnp.float32),
        in_specs=[_VMEM_SPEC] * 13,                              # whole-array VMEM residents
        out_specs=_VMEM_SPEC,
    )(x2, wproj, wo, wffn, w3, gatt, gffn, cos, sin, gfin, wout_pad,
      neg_causal, head_mask)

    logits = logits_pad[:, :VOCAB].reshape(B, S, VOCAB)
    # TODO(synk): cross-entropy loss (targets path) omitted; forward called with targets=None.
    return logits, None


# ---------------------------- parameter construction & packing -------------------------
def xavier_t(key, fan_in, fan_out):
    # xavier_normal_ on a torch Linear weight (out, in); generated directly in
    # transposed (in, out) layout for `x @ W`.
    std = math.sqrt(2.0 / (fan_in + fan_out))
    return std * jax.random.normal(key, (fan_in, fan_out), jnp.float32)


def init_raw_params(key):
    keys = jax.random.split(key, 1 + N_LAYERS * 7)
    std_tied = math.sqrt(2.0 / (VOCAB + MODEL_DIM))
    w_tied = std_tied * jax.random.normal(keys[0], (VOCAB, MODEL_DIM), jnp.float32)

    layers = []
    ki = 1
    for _ in range(N_LAYERS):
        wq = xavier_t(keys[ki + 0], MODEL_DIM, MODEL_DIM)
        wk = xavier_t(keys[ki + 1], MODEL_DIM, KV_DIM)
        wv = xavier_t(keys[ki + 2], MODEL_DIM, KV_DIM)
        wo = xavier_t(keys[ki + 3], MODEL_DIM, MODEL_DIM)
        w1 = xavier_t(keys[ki + 4], MODEL_DIM, 4 * MODEL_DIM)
        w2 = xavier_t(keys[ki + 5], MODEL_DIM, 2 * MODEL_DIM)
        w3 = xavier_t(keys[ki + 6], 2 * MODEL_DIM, MODEL_DIM)
        g_att = jnp.ones((1, MODEL_DIM), jnp.float32)
        g_ffn = jnp.ones((1, MODEL_DIM), jnp.float32)
        layers.append((wq, wk, wv, wo, w1, w2, w3, g_att, g_ffn))
        ki += 7
    g_final = jnp.ones((1, MODEL_DIM), jnp.float32)
    return w_tied, layers, g_final


def make_rope_tables(seq_len, head_dim, theta, n_heads):
    j = jnp.arange(0, head_dim, 2, dtype=jnp.float32)
    inv_freq = 1.0 / (theta ** (j / head_dim))                   # (hd/2,)
    t = jnp.arange(seq_len, dtype=jnp.float32)
    ang = jnp.outer(t, inv_freq)                                 # (S, hd/2)
    cos_i = jnp.repeat(jnp.cos(ang), 2, axis=1)                  # (S, hd)
    sin_i = jnp.repeat(jnp.sin(ang), 2, axis=1)
    sign = jnp.tile(jnp.array([-1.0, 1.0], jnp.float32), head_dim // 2)
    sin_i = sin_i * sign                                         # [-s, +s, -s, +s, ...]
    cos = jnp.tile(cos_i, (1, n_heads))                          # (S, HD)
    sin = jnp.tile(sin_i, (1, n_heads))
    return cos, sin


def pack_params(w_tied, layers, g_final):
    """One-time glue: fold GQA expansion, RoPE pair-swap and 1/sqrt(hd) scale into the
    fused projection weight; fuse W1|W2; stack per-layer weights (cast to bf16);
    transpose+pad the tied head; precompute the attention masks and row-RoPE tables."""
    group = N_Q_HEADS // N_KV_HEADS
    scale = 1.0 / math.sqrt(HEAD_DIM)
    # GQA expansion: query head h uses kv head h // group (repeat_interleave semantics)
    exp_cols = jnp.concatenate(
        [jnp.arange(HEAD_DIM, dtype=jnp.int32) + (h // group) * HEAD_DIM
         for h in range(N_Q_HEADS)])
    # interleaved RoPE pair swap: (2j, 2j+1) -> (2j+1, 2j)
    swap_cols = jnp.arange(HD, dtype=jnp.int32) ^ 1

    wproj_l, wo_l, wffn_l, w3_l, gatt_l, gffn_l = [], [], [], [], [], []
    for (wq, wk, wv, wo, w1, w2, w3, g_att, g_ffn) in layers:
        wq_s = wq * scale                         # fold attention scale into Wq
        wk_e = wk[:, exp_cols]                    # (D, HD)
        wv_e = wv[:, exp_cols]                    # (D, HD)
        wproj = jnp.concatenate(
            [wq_s, wk_e, wv_e, wq_s[:, swap_cols], wk_e[:, swap_cols]], axis=1)  # (D, 5*HD)
        wffn = jnp.concatenate([w1, w2], axis=1)  # (D, 6*D): [w1_x | w1_gate | w2]
        wproj_l.append(wproj)
        wo_l.append(wo)
        wffn_l.append(wffn)
        w3_l.append(w3)
        gatt_l.append(g_att)
        gffn_l.append(g_ffn)

    # RoPE tables per row of the collapsed (B*S, D) activation slab (position = row % S)
    cos, sin = make_rope_tables(SEQ, HEAD_DIM, ROPE_THETA, N_Q_HEADS)
    cos2 = jnp.tile(cos, (BATCH, 1))                             # (R, HD)
    sin2 = jnp.tile(sin, (BATCH, 1))

    # Additive causal + batch-block mask on lane-concatenated scores (R, HBS).
    # score column = head * R + (key_batch * S + key_pos)
    row = jnp.arange(ROWS, dtype=jnp.int32)[:, None]
    col = jnp.arange(HBS, dtype=jnp.int32)[None, :]
    qb, qs = row // SEQ, row % SEQ
    kin = col % ROWS
    kb, kt = kin // SEQ, kin % SEQ
    allowed = (kb == qb) & (kt <= qs)
    neg_causal = jnp.where(allowed, 0.0, -1e30).astype(jnp.float32)   # finite fill, f32 path

    # Head-block mask for the K/V slabs (HBS, HD): slab-row head == column head.
    rr = jnp.arange(HBS, dtype=jnp.int32)[:, None] // ROWS
    cc = jnp.arange(HD, dtype=jnp.int32)[None, :] // HEAD_DIM
    head_mask = (rr == cc).astype(jnp.bfloat16)

    # Tied LM head: transpose once, zero-pad to 128 lanes for lane-dense stores.
    wout_pad = jnp.zeros((MODEL_DIM, VOCAB_PAD), jnp.float32)
    wout_pad = wout_pad.at[:, :VOCAB].set(w_tied.T)

    bf = jnp.bfloat16
    packed = (
        w_tied,                                   # (V, D) embedding table (f32, gather in glue)
        jnp.stack(wproj_l).astype(bf), jnp.stack(wo_l).astype(bf),
        jnp.stack(wffn_l).astype(bf), jnp.stack(w3_l).astype(bf),
        jnp.stack(gatt_l), jnp.stack(gffn_l),
        cos2, sin2,
        g_final,
        wout_pad.astype(bf),
        neg_causal, head_mask,
    )
    return packed


# ---------------------------- main ------------------------------------------------------
if __name__ == "__main__":
    key = jax.random.PRNGKey(0)
    k_params, k_tok = jax.random.split(key)

    w_tied, layers, g_final = init_raw_params(k_params)
    packed = pack_params(w_tied, layers, g_final)

    tokens = jax.random.randint(k_tok, (BATCH, SEQ), 0, VOCAB, dtype=jnp.int32)

    fwd = jax.jit(dumble_llm_forward)
    logits, loss = fwd(tokens, packed)
    jax.block_until_ready(logits)
    assert logits.shape == (BATCH, SEQ, VOCAB)
    assert bool(jnp.isfinite(logits).all())
    print("KERNEL_OK")
</pallas_src>

<mosaic_0001>
module attributes {stable_mosaic.version = 11 : i64} {
  func.func @fused_forward_kernel(%arg0: memref<16x32xf32, #tpu.memory_space<vmem>>, %arg1: memref<2x32x160xbf16, #tpu.memory_space<vmem>>, %arg2: memref<2x32x32xbf16, #tpu.memory_space<vmem>>, %arg3: memref<2x32x192xbf16, #tpu.memory_space<vmem>>, %arg4: memref<2x64x32xbf16, #tpu.memory_space<vmem>>, %arg5: memref<2x1x32xf32, #tpu.memory_space<vmem>>, %arg6: memref<2x1x32xf32, #tpu.memory_space<vmem>>, %arg7: memref<16x32xf32, #tpu.memory_space<vmem>>, %arg8: memref<16x32xf32, #tpu.memory_space<vmem>>, %arg9: memref<1x32xf32, #tpu.memory_space<vmem>>, %arg10: memref<32x128xbf16, #tpu.memory_space<vmem>>, %arg11: memref<16x64xf32, #tpu.memory_space<vmem>>, %arg12: memref<64x32xbf16, #tpu.memory_space<vmem>>, %arg13: memref<16x128xf32, #tpu.memory_space<vmem>>) attributes {dimension_semantics = [], scalar_prefetch = 0 : i64, scratch_operands = 0 : i64, tpu.core_type = #tpu.core_type<tc>} {
    %c0 = arith.constant 0 : index
    %c0_0 = arith.constant 0 : index
    %0 = vector.load %arg0[%c0, %c0_0] : memref<16x32xf32, #tpu.memory_space<vmem>>, vector<16x32xf32>
    %c0_1 = arith.constant 0 : index
    %c0_2 = arith.constant 0 : index
    %1 = vector.load %arg7[%c0_1, %c0_2] : memref<16x32xf32, #tpu.memory_space<vmem>>, vector<16x32xf32>
    %c0_3 = arith.constant 0 : index
    %c0_4 = arith.constant 0 : index
    %2 = vector.load %arg8[%c0_3, %c0_4] : memref<16x32xf32, #tpu.memory_space<vmem>>, vector<16x32xf32>
    %c0_5 = arith.constant 0 : index
    %c0_6 = arith.constant 0 : index
    %3 = vector.load %arg11[%c0_5, %c0_6] : memref<16x64xf32, #tpu.memory_space<vmem>>, vector<16x64xf32>
    %c0_7 = arith.constant 0 : index
    %c0_8 = arith.constant 0 : index
    %4 = vector.load %arg12[%c0_7, %c0_8] : memref<64x32xbf16, #tpu.memory_space<vmem>>, vector<64x32xbf16>
    %c0_9 = arith.constant 0 : index
    %c0_10 = arith.constant 0 : index
    %c0_11 = arith.constant 0 : index
    %5 = vector.load %arg5[%c0_9, %c0_10, %c0_11] : memref<2x1x32xf32, #tpu.memory_space<vmem>>, vector<1x1x32xf32>
    %6 = vector.shape_cast %5 : vector<1x1x32xf32> to vector<1x32xf32>
    %7 = arith.mulf %0, %0 : vector<16x32xf32>
    %cst = arith.constant dense<0.000000e+00> : vector<16xf32>
    %8 = vector.multi_reduction <add>, %7, %cst [1] : vector<16x32xf32> to vector<16xf32>
    %9 = vector.shape_cast %8 : vector<16xf32> to vector<16x1xf32>
    %cst_12 = arith.constant 3.200000e+01 : f32
    %10 = vector.broadcast %cst_12 : f32 to vector<16x1xf32>
    %11 = arith.divf %9, %10 : vector<16x1xf32>
    %cst_13 = arith.constant 1.1920929E-7 : f32
    %12 = vector.broadcast %cst_13 : f32 to vector<16x1xf32>
    %13 = arith.addf %11, %12 : vector<16x1xf32>
    %14 = math.rsqrt %13 : vector<16x1xf32>
    %15 = vector.broadcast %14 : vector<16x1xf32> to vector<16x32xf32>
    %16 = arith.mulf %0, %15 : vector<16x32xf32>
    %17 = vector.broadcast %6 : vector<1x32xf32> to vector<16x32xf32>
    %18 = arith.mulf %16, %17 : vector<16x32xf32>
    %19 = arith.truncf %18 : vector<16x32xf32> to vector<16x32xbf16>
    %c0_14 = arith.constant 0 : index
    %c0_15 = arith.constant 0 : index
    %c0_16 = arith.constant 0 : index
    %20 = vector.load %arg1[%c0_14, %c0_15, %c0_16] : memref<2x32x160xbf16, #tpu.memory_space<vmem>>, vector<1x32x160xbf16>
    %21 = vector.shape_cast %20 : vector<1x32x160xbf16> to vector<32x160xbf16>
    %cst_17 = arith.constant dense<0.000000e+00> : vector<16x160xf32>
    %22 = tpu.matmul %19, %21, %cst_17 {dimension_numbers = #tpu.dot_dimension_numbers<[1], [0], [0], [1], [0, 0, 1, 1], [], []>} : vector<16x32xbf16>, vector<32x160xbf16>, vector<16x160xf32> -> vector<16x160xf32>
    %23 = vector.extract_strided_slice %22 {offsets = [0, 0], sizes = [16, 32], strides = [1, 1]} : vector<16x160xf32> to vector<16x32xf32>
    %24 = vector.extract_strided_slice %22 {offsets = [0, 32], sizes = [16, 32], strides = [1, 1]} : vector<16x160xf32> to vector<16x32xf32>
    %25 = vector.extract_strided_slice %22 {offsets = [0, 64], sizes = [16, 32], strides = [1, 1]} : vector<16x160xf32> to vector<16x32xf32>
    %26 = vector.extract_strided_slice %22 {offsets = [0, 96], sizes = [16, 32], strides = [1, 1]} : vector<16x160xf32> to vector<16x32xf32>
    %27 = vector.extract_strided_slice %22 {offsets = [0, 128], sizes = [16, 32], strides = [1, 1]} : vector<16x160xf32> to vector<16x32xf32>
    %28 = arith.mulf %23, %1 : vector<16x32xf32>
    %29 = arith.mulf %26, %2 : vector<16x32xf32>
    %30 = arith.addf %28, %29 : vector<16x32xf32>
    %31 = arith.mulf %24, %1 : vector<16x32xf32>
    %32 = arith.mulf %27, %2 : vector<16x32xf32>
    %33 = arith.addf %31, %32 : vector<16x32xf32>
    %34 = tpu.concatenate %33, %33, %33, %33 in 0 : vector<16x32xf32>, vector<16x32xf32>, vector<16x32xf32>, vector<16x32xf32> -> vector<64x32xf32>
    %35 = arith.truncf %34 : vector<64x32xf32> to vector<64x32xbf16>
    %36 = arith.mulf %35, %4 : vector<64x32xbf16>
    %37 = tpu.concatenate %25, %25, %25, %25 in 0 : vector<16x32xf32>, vector<16x32xf32>, vector<16x32xf32>, vector<16x32xf32> -> vector<64x32xf32>
    %38 = arith.truncf %37 : vector<64x32xf32> to vector<64x32xbf16>
    %39 = arith.mulf %38, %4 : vector<64x32xbf16>
    %40 = arith.truncf %30 : vector<16x32xf32> to vector<16x32xbf16>
    %cst_18 = arith.constant dense<0.000000e+00> : vector<16x64xf32>
    %41 = tpu.matmul %40, %36, %cst_18 {dimension_numbers = #tpu.dot_dimension_numbers<[1], [1], [0], [0], [0, 0, 1, 0], [], []>} : vector<16x32xbf16>, vector<64x32xbf16>, vector<16x64xf32> -> vector<16x64xf32>
    %42 = arith.addf %41, %3 : vector<16x64xf32>
    %43 = vector.extract_strided_slice %42 {offsets = [0, 0], sizes = [16, 16], strides = [1, 1]} : vector<16x64xf32> to vector<16x16xf32>
    %cst_19 = arith.constant dense<0xFF800000> : vector<16xf32>
    %44 = vector.multi_reduction <maximumf>, %43, %cst_19 [1] : vector<16x16xf32> to vector<16xf32>
    %45 = vector.shape_cast %44 : vector<16xf32> to vector<16x1xf32>
    %46 = vector.broadcast %45 : vector<16x1xf32> to vector<16x16xf32>
    %47 = arith.subf %43, %46 : vector<16x16xf32>
    %48 = math.exp %47 : vector<16x16xf32>
    %cst_20 = arith.constant dense<0.000000e+00> : vector<16xf32>
    %49 = vector.multi_reduction <add>, %48, %cst_20 [1] : vector<16x16xf32> to vector<16xf32>
    %50 = vector.shape_cast %49 : vector<16xf32> to vector<16x1xf32>
    %51 = tpu.reciprocal %50 {approx = true} : vector<16x1xf32> -> vector<16x1xf32>
    %52 = vector.broadcast %51 : vector<16x1xf32> to vector<16x16xf32>
    %53 = arith.mulf %48, %52 : vector<16x16xf32>
    %54 = vector.extract_strided_slice %42 {offsets = [0, 16], sizes = [16, 16], strides = [1, 1]} : vector<16x64xf32> to vector<16x16xf32>
    %cst_21 = arith.constant dense<0xFF800000> : vector<16xf32>
    %55 = vector.multi_reduction <maximumf>, %54, %cst_21 [1] : vector<16x16xf32> to vector<16xf32>
    %56 = vector.shape_cast %55 : vector<16xf32> to vector<16x1xf32>
    %57 = vector.broadcast %56 : vector<16x1xf32> to vector<16x16xf32>
    %58 = arith.subf %54, %57 : vector<16x16xf32>
    %59 = math.exp %58 : vector<16x16xf32>
    %cst_22 = arith.constant dense<0.000000e+00> : vector<16xf32>
    %60 = vector.multi_reduction <add>, %59, %cst_22 [1] : vector<16x16xf32> to vector<16xf32>
    %61 = vector.shape_cast %60 : vector<16xf32> to vector<16x1xf32>
    %62 = tpu.reciprocal %61 {approx = true} : vector<16x1xf32> -> vector<16x1xf32>
    %63 = vector.broadcast %62 : vector<16x1xf32> to vector<16x16xf32>
    %64 = arith.mulf %59, %63 : vector<16x16xf32>
    %65 = vector.extract_strided_slice %42 {offsets = [0, 32], sizes = [16, 16], strides = [1, 1]} : vector<16x64xf32> to vector<16x16xf32>
    %cst_23 = arith.constant dense<0xFF800000> : vector<16xf32>
    %66 = vector.multi_reduction <maximumf>, %65, %cst_23 [1] : vector<16x16xf32> to vector<16xf32>
    %67 = vector.shape_cast %66 : vector<16xf32> to vector<16x1xf32>
    %68 = vector.broadcast %67 : vector<16x1xf32> to vector<16x16xf32>
    %69 = arith.subf %65, %68 : vector<16x16xf32>
    %70 = math.exp %69 : vector<16x16xf32>
    %cst_24 = arith.constant dense<0.000000e+00> : vector<16xf32>
    %71 = vector.multi_reduction <add>, %70, %cst_24 [1] : vector<16x16xf32> to vector<16xf32>
    %72 = vector.shape_cast %71 : vector<16xf32> to vector<16x1xf32>
    %73 = tpu.reciprocal %72 {approx = true} : vector<16x1xf32> -> vector<16x1xf32>
    %74 = vector.broadcast %73 : vector<16x1xf32> to vector<16x16xf32>
    %75 = arith.mulf %70, %74 : vector<16x16xf32>
    %76 = vector.extract_strided_slice %42 {offsets = [0, 48], sizes = [16, 16], strides = [1, 1]} : vector<16x64xf32> to vector<16x16xf32>
    %cst_25 = arith.constant dense<0xFF800000> : vector<16xf32>
    %77 = vector.multi_reduction <maximumf>, %76, %cst_25 [1] : vector<16x16xf32> to vector<16xf32>
    %78 = vector.shape_cast %77 : vector<16xf32> to vector<16x1xf32>
    %79 = vector.broadcast %78 : vector<16x1xf32> to vector<16x16xf32>
    %80 = arith.subf %76, %79 : vector<16x16xf32>
    %81 = math.exp %80 : vector<16x16xf32>
    %cst_26 = arith.constant dense<0.000000e+00> : vector<16xf32>
    %82 = vector.multi_reduction <add>, %81, %cst_26 [1] : vector<16x16xf32> to vector<16xf32>
    %83 = vector.shape_cast %82 : vector<16xf32> to vector<16x1xf32>
    %84 = tpu.reciprocal %83 {approx = true} : vector<16x1xf32> -> vector<16x1xf32>
    %85 = vector.broadcast %84 : vector<16x1xf32> to vector<16x16xf32>
    %86 = arith.mulf %81, %85 : vector<16x16xf32>
    %87 = tpu.concatenate %53, %64, %75, %86 in 1 : vector<16x16xf32>, vector<16x16xf32>, vector<16x16xf32>, vector<16x16xf32> -> vector<16x64xf32>
    %88 = arith.truncf %87 : vector<16x64xf32> to vector<16x64xbf16>
    %cst_27 = arith.constant dense<0.000000e+00> : vector<16x32xf32>
    %89 = tpu.matmul %88, %39, %cst_27 {dimension_numbers = #tpu.dot_dimension_numbers<[1], [0], [0], [1], [0, 0, 1, 1], [], []>} : vector<16x64xbf16>, vector<64x32xbf16>, vector<16x32xf32> -> vector<16x32xf32>
    %90 = arith.truncf %89 : vector<16x32xf32> to vector<16x32xbf16>
    %c0_28 = arith.constant 0 : index
    %c0_29 = arith.constant 0 : index
    %c0_30 = arith.constant 0 : index
    %91 = vector.load %arg2[%c0_28, %c0_29, %c0_30] : memref<2x32x32xbf16, #tpu.memory_space<vmem>>, vector<1x32x32xbf16>
    %92 = vector.shape_cast %91 : vector<1x32x32xbf16> to vector<32x32xbf16>
    %cst_31 = arith.constant dense<0.000000e+00> : vector<16x32xf32>
    %93 = tpu.matmul %90, %92, %cst_31 {dimension_numbers = #tpu.dot_dimension_numbers<[1], [0], [0], [1], [0, 0, 1, 1], [], []>} : vector<16x32xbf16>, vector<32x32xbf16>, vector<16x32xf32> -> vector<16x32xf32>
    %94 = arith.addf %0, %93 : vector<16x32xf32>
    %c0_32 = arith.constant 0 : index
    %c0_33 = arith.constant 0 : index
    %c0_34 = arith.constant 0 : index
    %95 = vector.load %arg6[%c0_32, %c0_33, %c0_34] : memref<2x1x32xf32, #tpu.memory_space<vmem>>, vector<1x1x32xf32>
    %96 = vector.shape_cast %95 : vector<1x1x32xf32> to vector<1x32xf32>
    %97 = arith.mulf %94, %94 : vector<16x32xf32>
    %cst_35 = arith.constant dense<0.000000e+00> : vector<16xf32>
    %98 = vector.multi_reduction <add>, %97, %cst_35 [1] : vector<16x32xf32> to vector<16xf32>
    %99 = vector.shape_cast %98 : vector<16xf32> to vector<16x1xf32>
    %cst_36 = arith.constant 3.200000e+01 : f32
    %100 = vector.broadcast %cst_36 : f32 to vector<16x1xf32>
    %101 = arith.divf %99, %100 : vector<16x1xf32>
    %cst_37 = arith.constant 1.1920929E-7 : f32
    %102 = vector.broadcast %cst_37 : f32 to vector<16x1xf32>
    %103 = arith.addf %101, %102 : vector<16x1xf32>
    %104 = math.rsqrt %103 : vector<16x1xf32>
    %105 = vector.broadcast %104 : vector<16x1xf32> to vector<16x32xf32>
    %106 = arith.mulf %94, %105 : vector<16x32xf32>
    %107 = vector.broadcast %96 : vector<1x32xf32> to vector<16x32xf32>
    %108 = arith.mulf %106, %107 : vector<16x32xf32>
    %109 = arith.truncf %108 : vector<16x32xf32> to vector<16x32xbf16>
    %c0_38 = arith.constant 0 : index
    %c0_39 = arith.constant 0 : index
    %c0_40 = arith.constant 0 : index
    %110 = vector.load %arg3[%c0_38, %c0_39, %c0_40] : memref<2x32x192xbf16, #tpu.memory_space<vmem>>, vector<1x32x192xbf16>
    %111 = vector.shape_cast %110 : vector<1x32x192xbf16> to vector<32x192xbf16>
    %cst_41 = arith.constant dense<0.000000e+00> : vector<16x192xf32>
    %112 = tpu.matmul %109, %111, %cst_41 {dimension_numbers = #tpu.dot_dimension_numbers<[1], [0], [0], [1], [0, 0, 1, 1], [], []>} : vector<16x32xbf16>, vector<32x192xbf16>, vector<16x192xf32> -> vector<16x192xf32>
    %113 = vector.extract_strided_slice %112 {offsets = [0, 0], sizes = [16, 64], strides = [1, 1]} : vector<16x192xf32> to vector<16x64xf32>
    %114 = vector.extract_strided_slice %112 {offsets = [0, 64], sizes = [16, 64], strides = [1, 1]} : vector<16x192xf32> to vector<16x64xf32>
    %115 = vector.extract_strided_slice %112 {offsets = [0, 128], sizes = [16, 64], strides = [1, 1]} : vector<16x192xf32> to vector<16x64xf32>
    %116 = arith.negf %114 : vector<16x64xf32>
    %117 = math.exp %116 : vector<16x64xf32>
    %cst_42 = arith.constant 1.000000e+00 : f32
    %118 = vector.broadcast %cst_42 : f32 to vector<16x64xf32>
    %119 = arith.addf %118, %117 : vector<16x64xf32>
    %120 = arith.divf %118, %119 : vector<16x64xf32>
    %121 = arith.mulf %114, %120 : vector<16x64xf32>
    %122 = arith.mulf %113, %121 : vector<16x64xf32>
    %123 = arith.mulf %122, %115 : vector<16x64xf32>
    %124 = arith.truncf %123 : vector<16x64xf32> to vector<16x64xbf16>
    %c0_43 = arith.constant 0 : index
    %c0_44 = arith.constant 0 : index
    %c0_45 = arith.constant 0 : index
    %125 = vector.load %arg4[%c0_43, %c0_44, %c0_45] : memref<2x64x32xbf16, #tpu.memory_space<vmem>>, vector<1x64x32xbf16>
    %126 = vector.shape_cast %125 : vector<1x64x32xbf16> to vector<64x32xbf16>
    %cst_46 = arith.constant dense<0.000000e+00> : vector<16x32xf32>
    %127 = tpu.matmul %124, %126, %cst_46 {dimension_numbers = #tpu.dot_dimension_numbers<[1], [0], [0], [1], [0, 0, 1, 1], [], []>} : vector<16x64xbf16>, vector<64x32xbf16>, vector<16x32xf32> -> vector<16x32xf32>
    %128 = arith.addf %94, %127 : vector<16x32xf32>
    %c1 = arith.constant 1 : index
    %c0_47 = arith.constant 0 : index
    %c0_48 = arith.constant 0 : index
    %129 = vector.load %arg5[%c1, %c0_47, %c0_48] : memref<2x1x32xf32, #tpu.memory_space<vmem>>, vector<1x1x32xf32>
    %130 = vector.shape_cast %129 : vector<1x1x32xf32> to vector<1x32xf32>
    %131 = arith.mulf %128, %128 : vector<16x32xf32>
    %cst_49 = arith.constant dense<0.000000e+00> : vector<16xf32>
    %132 = vector.multi_reduction <add>, %131, %cst_49 [1] : vector<16x32xf32> to vector<16xf32>
    %133 = vector.shape_cast %132 : vector<16xf32> to vector<16x1xf32>
    %cst_50 = arith.constant 3.200000e+01 : f32
    %134 = vector.broadcast %cst_50 : f32 to vector<16x1xf32>
    %135 = arith.divf %133, %134 : vector<16x1xf32>
    %cst_51 = arith.constant 1.1920929E-7 : f32
    %136 = vector.broadcast %cst_51 : f32 to vector<16x1xf32>
    %137 = arith.addf %135, %136 : vector<16x1xf32>
    %138 = math.rsqrt %137 : vector<16x1xf32>
    %139 = vector.broadcast %138 : vector<16x1xf32> to vector<16x32xf32>
    %140 = arith.mulf %128, %139 : vector<16x32xf32>
    %141 = vector.broadcast %130 : vector<1x32xf32> to vector<16x32xf32>
    %142 = arith.mulf %140, %141 : vector<16x32xf32>
    %143 = arith.truncf %142 : vector<16x32xf32> to vector<16x32xbf16>
    %c1_52 = arith.constant 1 : index
    %c0_53 = arith.constant 0 : index
    %c0_54 = arith.constant 0 : index
    %144 = vector.load %arg1[%c1_52, %c0_53, %c0_54] : memref<2x32x160xbf16, #tpu.memory_space<vmem>>, vector<1x32x160xbf16>
    %145 = vector.shape_cast %144 : vector<1x32x160xbf16> to vector<32x160xbf16>
    %cst_55 = arith.constant dense<0.000000e+00> : vector<16x160xf32>
    %146 = tpu.matmul %143, %145, %cst_55 {dimension_numbers = #tpu.dot_dimension_numbers<[1], [0], [0], [1], [0, 0, 1, 1], [], []>} : vector<16x32xbf16>, vector<32x160xbf16>, vector<16x160xf32> -> vector<16x160xf32>
    %147 = vector.extract_strided_slice %146 {offsets = [0, 0], sizes = [16, 32], strides = [1, 1]} : vector<16x160xf32> to vector<16x32xf32>
    %148 = vector.extract_strided_slice %146 {offsets = [0, 32], sizes = [16, 32], strides = [1, 1]} : vector<16x160xf32> to vector<16x32xf32>
    %149 = vector.extract_strided_slice %146 {offsets = [0, 64], sizes = [16, 32], strides = [1, 1]} : vector<16x160xf32> to vector<16x32xf32>
    %150 = vector.extract_strided_slice %146 {offsets = [0, 96], sizes = [16, 32], strides = [1, 1]} : vector<16x160xf32> to vector<16x32xf32>
    %151 = vector.extract_strided_slice %146 {offsets = [0, 128], sizes = [16, 32], strides = [1, 1]} : vector<16x160xf32> to vector<16x32xf32>
    %152 = arith.mulf %147, %1 : vector<16x32xf32>
    %153 = arith.mulf %150, %2 : vector<16x32xf32>
    %154 = arith.addf %152, %153 : vector<16x32xf32>
    %155 = arith.mulf %148, %1 : vector<16x32xf32>
    %156 = arith.mulf %151, %2 : vector<16x32xf32>
    %157 = arith.addf %155, %156 : vector<16x32xf32>
    %158 = tpu.concatenate %157, %157, %157, %157 in 0 : vector<16x32xf32>, vector<16x32xf32>, vector<16x32xf32>, vector<16x32xf32> -> vector<64x32xf32>
    %159 = arith.truncf %158 : vector<64x32xf32> to vector<64x32xbf16>
    %160 = arith.mulf %159, %4 : vector<64x32xbf16>
    %161 = tpu.concatenate %149, %149, %149, %149 in 0 : vector<16x32xf32>, vector<16x32xf32>, vector<16x32xf32>, vector<16x32xf32> -> vector<64x32xf32>
    %162 = arith.truncf %161 : vector<64x32xf32> to vector<64x32xbf16>
    %163 = arith.mulf %162, %4 : vector<64x32xbf16>
    %164 = arith.truncf %154 : vector<16x32xf32> to vector<16x32xbf16>
    %cst_56 = arith.constant dense<0.000000e+00> : vector<16x64xf32>
    %165 = tpu.matmul %164, %160, %cst_56 {dimension_numbers = #tpu.dot_dimension_numbers<[1], [1], [0], [0], [0, 0, 1, 0], [], []>} : vector<16x32xbf16>, vector<64x32xbf16>, vector<16x64xf32> -> vector<16x64xf32>
    %166 = arith.addf %165, %3 : vector<16x64xf32>
    %167 = vector.extract_strided_slice %166 {offsets = [0, 0], sizes = [16, 16], strides = [1, 1]} : vector<16x64xf32> to vector<16x16xf32>
    %cst_57 = arith.constant dense<0xFF800000> : vector<16xf32>
    %168 = vector.multi_reduction <maximumf>, %167, %cst_57 [1] : vector<16x16xf32> to vector<16xf32>
    %169 = vector.shape_cast %168 : vector<16xf32> to vector<16x1xf32>
    %170 = vector.broadcast %169 : vector<16x1xf32> to vector<16x16xf32>
    %171 = arith.subf %167, %170 : vector<16x16xf32>
    %172 = math.exp %171 : vector<16x16xf32>
    %cst_58 = arith.constant dense<0.000000e+00> : vector<16xf32>
    %173 = vector.multi_reduction <add>, %172, %cst_58 [1] : vector<16x16xf32> to vector<16xf32>
    %174 = vector.shape_cast %173 : vector<16xf32> to vector<16x1xf32>
    %175 = tpu.reciprocal %174 {approx = true} : vector<16x1xf32> -> vector<16x1xf32>
    %176 = vector.broadcast %175 : vector<16x1xf32> to vector<16x16xf32>
    %177 = arith.mulf %172, %176 : vector<16x16xf32>
    %178 = vector.extract_strided_slice %166 {offsets = [0, 16], sizes = [16, 16], strides = [1, 1]} : vector<16x64xf32> to vector<16x16xf32>
    %cst_59 = arith.constant dense<0xFF800000> : vector<16xf32>
    %179 = vector.multi_reduction <maximumf>, %178, %cst_59 [1] : vector<16x16xf32> to vector<16xf32>
    %180 = vector.shape_cast %179 : vector<16xf32> to vector<16x1xf32>
    %181 = vector.broadcast %180 : vector<16x1xf32> to vector<16x16xf32>
    %182 = arith.subf %178, %181 : vector<16x16xf32>
    %183 = math.exp %182 : vector<16x16xf32>
    %cst_60 = arith.constant dense<0.000000e+00> : vector<16xf32>
    %184 = vector.multi_reduction <add>, %183, %cst_60 [1] : vector<16x16xf32> to vector<16xf32>
    %185 = vector.shape_cast %184 : vector<16xf32> to vector<16x1xf32>
    %186 = tpu.reciprocal %185 {approx = true} : vector<16x1xf32> -> vector<16x1xf32>
    %187 = vector.broadcast %186 : vector<16x1xf32> to vector<16x16xf32>
    %188 = arith.mulf %183, %187 : vector<16x16xf32>
    %189 = vector.extract_strided_slice %166 {offsets = [0, 32], sizes = [16, 16], strides = [1, 1]} : vector<16x64xf32> to vector<16x16xf32>
    %cst_61 = arith.constant dense<0xFF800000> : vector<16xf32>
    %190 = vector.multi_reduction <maximumf>, %189, %cst_61 [1] : vector<16x16xf32> to vector<16xf32>
    %191 = vector.shape_cast %190 : vector<16xf32> to vector<16x1xf32>
    %192 = vector.broadcast %191 : vector<16x1xf32> to vector<16x16xf32>
    %193 = arith.subf %189, %192 : vector<16x16xf32>
    %194 = math.exp %193 : vector<16x16xf32>
    %cst_62 = arith.constant dense<0.000000e+00> : vector<16xf32>
    %195 = vector.multi_reduction <add>, %194, %cst_62 [1] : vector<16x16xf32> to vector<16xf32>
    %196 = vector.shape_cast %195 : vector<16xf32> to vector<16x1xf32>
    %197 = tpu.reciprocal %196 {approx = true} : vector<16x1xf32> -> vector<16x1xf32>
    %198 = vector.broadcast %197 : vector<16x1xf32> to vector<16x16xf32>
    %199 = arith.mulf %194, %198 : vector<16x16xf32>
    %200 = vector.extract_strided_slice %166 {offsets = [0, 48], sizes = [16, 16], strides = [1, 1]} : vector<16x64xf32> to vector<16x16xf32>
    %cst_63 = arith.constant dense<0xFF800000> : vector<16xf32>
    %201 = vector.multi_reduction <maximumf>, %200, %cst_63 [1] : vector<16x16xf32> to vector<16xf32>
    %202 = vector.shape_cast %201 : vector<16xf32> to vector<16x1xf32>
    %203 = vector.broadcast %202 : vector<16x1xf32> to vector<16x16xf32>
    %204 = arith.subf %200, %203 : vector<16x16xf32>
    %205 = math.exp %204 : vector<16x16xf32>
    %cst_64 = arith.constant dense<0.000000e+00> : vector<16xf32>
    %206 = vector.multi_reduction <add>, %205, %cst_64 [1] : vector<16x16xf32> to vector<16xf32>
    %207 = vector.shape_cast %206 : vector<16xf32> to vector<16x1xf32>
    %208 = tpu.reciprocal %207 {approx = true} : vector<16x1xf32> -> vector<16x1xf32>
    %209 = vector.broadcast %208 : vector<16x1xf32> to vector<16x16xf32>
    %210 = arith.mulf %205, %209 : vector<16x16xf32>
    %211 = tpu.concatenate %177, %188, %199, %210 in 1 : vector<16x16xf32>, vector<16x16xf32>, vector<16x16xf32>, vector<16x16xf32> -> vector<16x64xf32>
    %212 = arith.truncf %211 : vector<16x64xf32> to vector<16x64xbf16>
    %cst_65 = arith.constant dense<0.000000e+00> : vector<16x32xf32>
    %213 = tpu.matmul %212, %163, %cst_65 {dimension_numbers = #tpu.dot_dimension_numbers<[1], [0], [0], [1], [0, 0, 1, 1], [], []>} : vector<16x64xbf16>, vector<64x32xbf16>, vector<16x32xf32> -> vector<16x32xf32>
    %214 = arith.truncf %213 : vector<16x32xf32> to vector<16x32xbf16>
    %c1_66 = arith.constant 1 : index
    %c0_67 = arith.constant 0 : index
    %c0_68 = arith.constant 0 : index
    %215 = vector.load %arg2[%c1_66, %c0_67, %c0_68] : memref<2x32x32xbf16, #tpu.memory_space<vmem>>, vector<1x32x32xbf16>
    %216 = vector.shape_cast %215 : vector<1x32x32xbf16> to vector<32x32xbf16>
    %cst_69 = arith.constant dense<0.000000e+00> : vector<16x32xf32>
    %217 = tpu.matmul %214, %216, %cst_69 {dimension_numbers = #tpu.dot_dimension_numbers<[1], [0], [0], [1], [0, 0, 1, 1], [], []>} : vector<16x32xbf16>, vector<32x32xbf16>, vector<16x32xf32> -> vector<16x32xf32>
    %218 = arith.addf %128, %217 : vector<16x32xf32>
    %c1_70 = arith.constant 1 : index
    %c0_71 = arith.constant 0 : index
    %c0_72 = arith.constant 0 : index
    %219 = vector.load %arg6[%c1_70, %c0_71, %c0_72] : memref<2x1x32xf32, #tpu.memory_space<vmem>>, vector<1x1x32xf32>
    %220 = vector.shape_cast %219 : vector<1x1x32xf32> to vector<1x32xf32>
    %221 = arith.mulf %218, %218 : vector<16x32xf32>
    %cst_73 = arith.constant dense<0.000000e+00> : vector<16xf32>
    %222 = vector.multi_reduction <add>, %221, %cst_73 [1] : vector<16x32xf32> to vector<16xf32>
    %223 = vector.shape_cast %222 : vector<16xf32> to vector<16x1xf32>
    %cst_74 = arith.constant 3.200000e+01 : f32
    %224 = vector.broadcast %cst_74 : f32 to vector<16x1xf32>
    %225 = arith.divf %223, %224 : vector<16x1xf32>
    %cst_75 = arith.constant 1.1920929E-7 : f32
    %226 = vector.broadcast %cst_75 : f32 to vector<16x1xf32>
    %227 = arith.addf %225, %226 : vector<16x1xf32>
    %228 = math.rsqrt %227 : vector<16x1xf32>
    %229 = vector.broadcast %228 : vector<16x1xf32> to vector<16x32xf32>
    %230 = arith.mulf %218, %229 : vector<16x32xf32>
    %231 = vector.broadcast %220 : vector<1x32xf32> to vector<16x32xf32>
    %232 = arith.mulf %230, %231 : vector<16x32xf32>
    %233 = arith.truncf %232 : vector<16x32xf32> to vector<16x32xbf16>
    %c1_76 = arith.constant 1 : index
    %c0_77 = arith.constant 0 : index
    %c0_78 = arith.constant 0 : index
    %234 = vector.load %arg3[%c1_76, %c0_77, %c0_78] : memref<2x32x192xbf16, #tpu.memory_space<vmem>>, vector<1x32x192xbf16>
    %235 = vector.shape_cast %234 : vector<1x32x192xbf16> to vector<32x192xbf16>
    %cst_79 = arith.constant dense<0.000000e+00> : vector<16x192xf32>
    %236 = tpu.matmul %233, %235, %cst_79 {dimension_numbers = #tpu.dot_dimension_numbers<[1], [0], [0], [1], [0, 0, 1, 1], [], []>} : vector<16x32xbf16>, vector<32x192xbf16>, vector<16x192xf32> -> vector<16x192xf32>
    %237 = vector.extract_strided_slice %236 {offsets = [0, 0], sizes = [16, 64], strides = [1, 1]} : vector<16x192xf32> to vector<16x64xf32>
    %238 = vector.extract_strided_slice %236 {offsets = [0, 64], sizes = [16, 64], strides = [1, 1]} : vector<16x192xf32> to vector<16x64xf32>
    %239 = vector.extract_strided_slice %236 {offsets = [0, 128], sizes = [16, 64], strides = [1, 1]} : vector<16x192xf32> to vector<16x64xf32>
    %240 = arith.negf %238 : vector<16x64xf32>
    %241 = math.exp %240 : vector<16x64xf32>
    %cst_80 = arith.constant 1.000000e+00 : f32
    %242 = vector.broadcast %cst_80 : f32 to vector<16x64xf32>
    %243 = arith.addf %242, %241 : vector<16x64xf32>
    %244 = arith.divf %242, %243 : vector<16x64xf32>
    %245 = arith.mulf %238, %244 : vector<16x64xf32>
    %246 = arith.mulf %237, %245 : vector<16x64xf32>
    %247 = arith.mulf %246, %239 : vector<16x64xf32>
    %248 = arith.truncf %247 : vector<16x64xf32> to vector<16x64xbf16>
    %c1_81 = arith.constant 1 : index
    %c0_82 = arith.constant 0 : index
    %c0_83 = arith.constant 0 : index
    %249 = vector.load %arg4[%c1_81, %c0_82, %c0_83] : memref<2x64x32xbf16, #tpu.memory_space<vmem>>, vector<1x64x32xbf16>
    %250 = vector.shape_cast %249 : vector<1x64x32xbf16> to vector<64x32xbf16>
    %cst_84 = arith.constant dense<0.000000e+00> : vector<16x32xf32>
    %251 = tpu.matmul %248, %250, %cst_84 {dimension_numbers = #tpu.dot_dimension_numbers<[1], [0], [0], [1], [0, 0, 1, 1], [], []>} : vector<16x64xbf16>, vector<64x32xbf16>, vector<16x32xf32> -> vector<16x32xf32>
    %252 = arith.addf %218, %251 : vector<16x32xf32>
    %c0_85 = arith.constant 0 : index
    %c0_86 = arith.constant 0 : index
    %253 = vector.load %arg9[%c0_85, %c0_86] : memref<1x32xf32, #tpu.memory_space<vmem>>, vector<1x32xf32>
    %254 = arith.mulf %252, %252 : vector<16x32xf32>
    %cst_87 = arith.constant dense<0.000000e+00> : vector<16xf32>
    %255 = vector.multi_reduction <add>, %254, %cst_87 [1] : vector<16x32xf32> to vector<16xf32>
    %256 = vector.shape_cast %255 : vector<16xf32> to vector<16x1xf32>
    %cst_88 = arith.constant 3.200000e+01 : f32
    %257 = vector.broadcast %cst_88 : f32 to vector<16x1xf32>
    %258 = arith.divf %256, %257 : vector<16x1xf32>
    %cst_89 = arith.constant 1.1920929E-7 : f32
    %259 = vector.broadcast %cst_89 : f32 to vector<16x1xf32>
    %260 = arith.addf %258, %259 : vector<16x1xf32>
    %261 = math.rsqrt %260 : vector<16x1xf32>
    %262 = vector.broadcast %261 : vector<16x1xf32> to vector<16x32xf32>
    %263 = arith.mulf %252, %262 : vector<16x32xf32>
    %264 = vector.broadcast %253 : vector<1x32xf32> to vector<16x32xf32>
    %265 = arith.mulf %263, %264 : vector<16x32xf32>
    %266 = arith.truncf %265 : vector<16x32xf32> to vector<16x32xbf16>
    %c0_90 = arith.constant 0 : index
    %c0_91 = arith.constant 0 : index
    %267 = vector.load %arg10[%c0_90, %c0_91] : memref<32x128xbf16, #tpu.memory_space<vmem>>, vector<32x128xbf16>
    %cst_92 = arith.constant dense<0.000000e+00> : vector<16x128xf32>
    %268 = tpu.matmul %266, %267, %cst_92 {dimension_numbers = #tpu.dot_dimension_numbers<[1], [0], [0], [1], [0, 0, 1, 1], [], []>} : vector<16x32xbf16>, vector<32x128xbf16>, vector<16x128xf32> -> vector<16x128xf32>
    %c0_93 = arith.constant 0 : index
    %c0_94 = arith.constant 0 : index
    %269 = vector.load %arg13[%c0_93, %c0_94] : memref<16x128xf32, #tpu.memory_space<vmem>>, vector<16x128xf32>
    tpu.vector_store %arg13[%c0_93, %c0_94], %268 {strides = array<i32>} : memref<16x128xf32, #tpu.memory_space<vmem>>, vector<16x128xf32>,
    return
  }
}

</mosaic_0001>

<bundles_post_ra>
// kernel: dumble_llm_forward.1
= control target key start
LH: loop header
LB: loop body
LE: loop exit
PB: predicated region body
PF: predicated region fallthrough
CT: control target
= control target key end

     0   :  { %vm64_vm0 = vcmask 261120   ;;  %v1882_v7 = vmov 0   ;;  %s1883_s21 = smov 32   ;;  %v1885_v41 = vmov 0.0   ;;  %vm1886_vm1 = vmmov 0   ;;  %s1888_s23 = smov 80   ;;  %s2534_s0 = inlined_call_operand.vmem [shape: f32[16,32], index: 0, kind: input, shape index: {}]   ;;  %s2535_s1 = inlined_call_operand.vmem [shape: bf16[2,32,160], index: 1, kind: input, shape index: {}]   ;;  %s2536_s7 = inlined_call_operand.vmem [shape: f32[16,32], index: 7, kind: input, shape index: {}]   ;;  %s2537_s5 = inlined_call_operand.vmem [shape: f32[2,1,32], index: 5, kind: input, shape index: {}]   ;;  %s2538_s12 = inlined_call_operand.vmem [shape: bf16[64,32], index: 12, kind: input, shape index: {}]   ;;  %s2539_s8 = inlined_call_operand.vmem [shape: f32[16,32], index: 8, kind: input, shape index: {}]   ;;  %s2540_s11 = inlined_call_operand.vmem [shape: f32[16,64], index: 11, kind: input, shape index: {}]   ;;  %s2541_s2 = inlined_call_operand.vmem [shape: bf16[2,32,32], index: 2, kind: input, shape index: {}]   ;;  %s2542_s3 = inlined_call_operand.vmem [shape: bf16[2,32,192], index: 3, kind: input, shape index: {}]   ;;  %s2543_s6 = inlined_call_operand.vmem [shape: f32[2,1,32], index: 6, kind: input, shape index: {}]   ;;  %s2544_s4 = inlined_call_operand.vmem [shape: bf16[2,64,32], index: 4, kind: input, shape index: {}]   ;;  %s2545_s10 = inlined_call_operand.vmem [shape: bf16[32,128], index: 10, kind: input, shape index: {}]   ;;  %s2546_s9 = inlined_call_operand.vmem [shape: f32[1,32], index: 9, kind: input, shape index: {}]   ;;  %s2547_s13 = inlined_call_operand.vmem [shape: f32[16,128], index: 13, kind: output, shape index: {}]  }
   0x1   :  { %v1963_v0 = vld [vmem:[%s2534_s0] sm:$0xff]  ;;  %v1968_v1 = vld [vmem:[%s2534_s0 + $0x8] sm:$0xff]  ;;  %148 = vmatprep.mubr.bf16.mxu0 %v1882_v7  ;;  %v1743_v9 = vld [vmem:[%s2535_s1 + $0x14] ss:$8 sps:$4 sm:$0xff]   ;;  %1636 = vmatprep.subr.bf16.mxu1 %v1885_v41  ;;  %vm380_vm2 = vcmask 392448   ;;  %vm349_vm3 = vcmask 261248  }
   0x2   :  { %v62_v2 = vmul.f32 %v1963_v0, %v1963_v0  ;;  %v63_v3 = vmul.f32 %v1968_v1, %v1968_v1  ;;  %v1740_v6 = vld [vmem:[%s2535_s1 + $0x4] ss:$8 sps:$4 sm:$0xff]   ;;  %v1742_v8 = vld [vmem:[%s2535_s1] ss:$8 sps:$4 sm:$0xff]   ;;  %v1745_v10 = vld [vmem:[%s2535_s1 + $0x10] ss:$8 sps:$4 sm:$0xff]   ;;  %1644 = vmatprep.mubr.msk.bf16.mxu1 %vm1886_vm1, %v1885_v41 }
   0x3   :  { %116 = vmatprep.subr.bf16.mxu0 %v1740_v6  ;;  %v1992_v11 = vld [vmem:[%s2536_s7] sm:$0xff]  ;;  %v1999_v12 = vld [vmem:[%s2536_s7 + $0x8] sm:$0xff]  ;;  %v2047_v38 = vld [vmem:[%s2538_s12 + $0x10] sm:$0xff]   ;;  %vm411_vm4 = vcmask 523648   ;;  %vm326_vm5 = vcmask 130048   ;;  %s1889_s24 = smov 64  }
   0x4   :  { %v65_v4 = vsel %vm64_vm0, %v62_v2, 0.0  ;;  %v68_v5 = vsel %vm64_vm0, %v63_v3, 0.0  ;;  %117 = vmatpush1.bf16.msra.mxu0 %v1742_v8  ;;  %183 = vrot.lane.b32.xlu1 %v1992_v11, %s1883_s21  ;;  %v1519_v22 = vld [vmem:[%s2537_s5] ss:$0 sm:$0xff]  ;;  %v2019_v30 = vld [vmem:[%s2539_s8 + $0x8] sm:$0xff]  ;;  %v2054_v39 = vld [vmem:[%s2538_s12 + $0x18] sm:$0xff]  }
   0x5   :  { %66 = vadd.xlane.f32.xlu0 %v65_v4  ;;  %118 = vmatprep.subr.bf16.mxu0 %v1743_v9  ;;  %v2012_v27 = vld [vmem:[%s2539_s8] sm:$0xff]  ;;  %s1884_s8 = smov 96   ;;  %v2040_v37 = vld [vmem:[%s2538_s12 + $0x8] sm:$0xff]   ;;  %vm446_vm6 = vcmask 392192   ;;  %vm466_vm7 = vcmask 523264  }
   0x6   :  { %v2031_v36 = vld [vmem:[%s2538_s12] sm:$0xff]  }
   0x8   :  { %119 = vmatpush1.bf16.msra.mxu0 %v1745_v10  ;;  %185 = vrot.lane.b32.xlu1 %v1999_v12, %s1883_s21 }
   0x9   :  { %69 = vadd.xlane.f32.xlu0 %v68_v5  ;;  %1648 = vmatprep.subr.bf16.mxu0 %v1885_v41 }
  0x76   :  { %v2060_v40 = vpop.permute.xlu1 %183 }
  0x7a   :  { %v2064_v42 = vpop.permute.xlu1 %185 }
  0x92   :  { %v67_v13 = vpop.xlane.xlu0 %66 }
  0x93   :  { %v72_v14 = vmul.f32 0.03125, %v67_v13 }
  0x95   :  { %v74_v15 = vadd.f32 1.1920929e-07, %v72_v14 }
  0x96   :  { %v70_v16 = vpop.xlane.xlu0 %69 }
  0x97   :  { %1782 = vrsqrt.f32 %v74_v15  ;;  %v73_v17 = vmul.f32 0.03125, %v70_v16 }
  0x99   :  { %v75_v18 = vadd.f32 1.1920929e-07, %v73_v17 }
  0x9b   :  { %1784 = vrsqrt.f32 %v75_v18  ;;  %v2115_v18 = vld [vmem:[%s2540_s11] sm:$0xff] }
  0xa1   :  { %v1783_v19 = vpop.eup %1782 }
  0xa2   :  { %v78_v20 = vmul.f32 %v1783_v19, %v1963_v0 }
  0xa4   :  { %v86_v24 = vmul.f32 %v1519_v22, %v78_v20  ;;  %v2120_v20 = vld [vmem:[%s2540_s11 + $0x8] sm:$0xff]  ;;  %s1887_s11 = smov 112  }
  0xa5   :  { %v1785_v21 = vpop.eup %1784 }
  0xa6   :  { %v79_v23 = vmul.f32 %v1785_v21, %v1968_v1 }
  0xa8   :  { %v87_v25 = vmul.f32 %v1519_v22, %v79_v23 }
  0xaa   :  { %v88_v26 = vpack.c.bf16 %v87_v25, %v86_v24 }
  0xac   :  { %1524 = vmatmul.mubr.msk.bf16.vlgmr.msra.gmra.mrb[0].mxu0 %vm64_vm0, %v88_v26 }
  0xad   :  { %1656 = vmatprep.mubr.msk.bf16.mxu0 %vm1886_vm1, %v1885_v41 }
 0x17f   :  { %v2014_v28 = vpop.f32.mrb[0].mxu0 }
 0x180   :  { %v152_v29 = vpop.f32.mrb[1].mxu0  ;;  %v189_v44 = vmul.f32 %v2060_v40, %v2014_v28  ;;  %v159_v8 = vmul.f32 %v2014_v28, %v1992_v11 }
 0x181   :  { %v191_v31 = vmul.f32 %v152_v29, %v2012_v27  ;;  %v154_v32 = vpop.f32.mrb[2].mxu0 }
 0x182   :  { %v2023_v33 = vpack.c.bf16 %v154_v32, %v2014_v28  ;;  %v156_v34 = vpop.f32.mrb[3].mxu0  ;;  %v190_v45 = vmul.f32 %v2064_v42, %v154_v32  ;;  %v160_v6 = vmul.f32 %v154_v32, %v1999_v12 }
 0x183   :  { %v192_v35 = vmul.f32 %v156_v34, %v2019_v30  ;;  %195 = vrot.lane.b32.xlu0 %v191_v31, %s1883_s21 }
 0x185   :  { %197 = vrot.lane.b32.xlu1 %v192_v35, %s1883_s21 }
 0x187   :  { %165 = vrot.lane.b32.xlu0 %v2019_v30, %s1884_s8 }
 0x189   :  { %224 = vrot.lane.b32.xlu1 %v2031_v36, %s1883_s21 }
 0x18d   :  { %226 = vrot.lane.b32.xlu1 %v2040_v37, %s1883_s21 }
 0x191   :  { %228 = vrot.lane.b32.xlu1 %v2047_v38, %s1883_s21 }
 0x195   :  { %230 = vrot.lane.b32.xlu1 %v2054_v39, %s1883_s21 }
 0x199   :  { %163 = vrot.lane.b32.xlu1 %v2012_v27, %s1884_s8 }
 0x1f5   :  { %v196_v43 = vpop.permute.xlu0 %195 }
 0x1f6   :  { %v201_v47 = vadd.f32 %v196_v43, %v189_v44 }
 0x1f7   :  { %v198_v46 = vpop.permute.xlu1 %197 }
 0x1f8   :  { %v202_v48 = vadd.f32 %v198_v46, %v190_v45 }
 0x1f9   :  { %v2084_v58 = vpop.permute.xlu0 %165 }
 0x1fa   :  { %v203_v49 = vpack.c.bf16 %v202_v48, %v201_v47  ;;  %v170_v60 = vmul.f32 %v2084_v58, %v154_v32 }
 0x1fb   :  { %v2069_v50 = vpop.permute.xlu1 %224 }
 0x1fc   :  { %v236_v51 = vmul.bf16 %v2069_v50, %v203_v49 }
 0x1fe   :  { %262 = vrot.lane.b32.xlu1 %v236_v51, %s1884_s8 }
 0x1ff   :  { %v2073_v52 = vpop.permute.xlu1 %226 }
 0x200   :  { %v237_v53 = vmul.bf16 %v2073_v52, %v203_v49 }
 0x202   :  { %264 = vrot.lane.b32.xlu0 %v237_v53, %s1884_s8 }
 0x203   :  { %v2077_v54 = vpop.permute.xlu1 %228 }
 0x204   :  { %v238_v55 = vmul.bf16 %v2077_v54, %v203_v49 }
 0x206   :  { %266 = vrot.lane.b32.xlu1 %v238_v55, %s1884_s8 }
 0x207   :  { %v2081_v56 = vpop.permute.xlu1 %230 }
 0x208   :  { %v239_v57 = vmul.bf16 %v2081_v56, %v203_v49 }
 0x20a   :  { %268 = vrot.lane.b32.xlu0 %v239_v57, %s1884_s8 }
 0x20b   :  { %v2087_v59 = vpop.permute.xlu1 %163 }
 0x20c   :  { %v169_v61 = vmul.f32 %v2087_v59, %v2014_v28 }
 0x20e   :  { %175 = vrot.lane.b32.xlu0 %v170_v60, %s1883_s21  ;;  %173 = vrot.lane.b32.xlu1 %v169_v61, %s1883_s21 }
 0x270   :  { %v263_v62 = vpop.permute.xlu1 %262 }
 0x271   :  { %v274_v63 = vsel %vm64_vm0, %v263_v62, 0 }
 0x272   :  { %1637 = vmatpush3.bf16.xpose.msra.mxu1 %v274_v63 }
 0x273   :  { %1638 = vmatprep.subr.bf16.mxu1 %v1885_v41 }
 0x274   :  { %v265_v2 = vpop.permute.xlu0 %264 }
 0x275   :  { %v277_v3 = vsel %vm64_vm0, %v265_v2, 0 }
 0x278   :  { %v267_v4 = vpop.permute.xlu1 %266 }
 0x279   :  { %v280_v13 = vsel %vm64_vm0, %v267_v4, 0 }
 0x27a   :  { %1639 = vmatpush3.bf16.xpose.msra.mxu1 %v277_v3 }
 0x27b   :  { %1640 = vmatprep.subr.bf16.mxu1 %v1885_v41 }
 0x27c   :  { %v269_v5 = vpop.permute.xlu0 %268 }
 0x27d   :  { %v283_v17 = vsel %vm64_vm0, %v269_v5, 0 }
 0x280   :  { %v176_v9 = vpop.permute.xlu0 %175  ;;  %v174_v10 = vpop.permute.xlu1 %173 }
 0x281   :  { %v180_v14 = vadd.f32 %v176_v9, %v160_v6  ;;  %v179_v15 = vadd.f32 %v174_v10, %v159_v8 }
 0x282   :  { %1641 = vmatpush3.bf16.xpose.msra.mxu1 %v280_v13 }
 0x283   :  { %v257_v16 = vpack.c.bf16 %v180_v14, %v179_v15  ;;  %1642 = vmatprep.subr.bf16.mxu1 %v1885_v41 }
 0x28a   :  { %1643 = vmatpush3.bf16.xpose.msra.mxu1 %v283_v17 }
 0x28b   :  { %1668 = vmatprep.subr.bf16.mxu1 %v1885_v41 }
 0x291   :  { %1645 = vmatmul.mubr.msk.bf16.vlgmr.msra.gmra.mrb[0].mxu1 %vm64_vm0, %v257_v16 }
 0x292   :  { %1676 = vmatprep.mubr.msk.bf16.mxu1 %vm1886_vm1, %v1885_v41 }
 0x364   :  { %v319_v19 = vpop.f32.mrb[0].mxu1 }
 0x365   :  { %v2123_v21 = vadd.f32 %v319_v19, %v2115_v18  ;;  %v1646_v22 = vpop.f32.mrb[1].mxu1 }
 0x366   :  { %v322_v23 = vpop.f32.mrb[2].mxu1 }
 0x367   :  { %v2126_v24 = vadd.f32 %v322_v23, %v2120_v20  ;;  %v1647_v25 = vpop.f32.mrb[3].mxu1  ;;  %v381_v26 = vsel %vm380_vm2, %v2123_v21, -inf  ;;  %v350_v28 = vsel %vm349_vm3, %v2123_v21, -inf  ;;  %v412_v34 = vsel %vm411_vm4, %v2123_v21, -inf }
 0x368   :  { %382 = vmax.xlane.f32.xlu0 %v381_v26  ;;  %351 = vmax.xlane.f32.xlu1 %v350_v28  ;;  %v327_v35 = vsel %vm326_vm5, %v2123_v21, -inf }
 0x369   :  { %v384_v29 = vsel %vm380_vm2, %v2126_v24, -inf  ;;  %v353_v31 = vsel %vm349_vm3, %v2126_v24, -inf  ;;  %v415_v32 = vsel %vm411_vm4, %v2126_v24, -inf  ;;  %v330_v43 = vsel %vm326_vm5, %v2126_v24, -inf }
 0x36c   :  { %385 = vmax.xlane.f32.xlu1 %v384_v29  ;;  %354 = vmax.xlane.f32.xlu0 %v353_v31 }
 0x370   :  { %416 = vmax.xlane.f32.xlu1 %v415_v32  ;;  %413 = vmax.xlane.f32.xlu0 %v412_v34 }
 0x374   :  { %328 = vmax.xlane.f32.xlu0 %v327_v35  ;;  %331 = vmax.xlane.f32.xlu1 %v330_v43 }
 0x3f5   :  { %v383_v44 = vpop.xlane.xlu0 %382  ;;  %v352_v45 = vpop.xlane.xlu1 %351 }
 0x3f6   :  { %v387_v46 = vsub.f32 %v2123_v21, %v383_v44  ;;  %v356_v47 = vsub.f32 %v2123_v21, %v352_v45 }
 0x3f8   :  { %v389_v48 = vmul.f32 1.442695, %v387_v46  ;;  %v358_v49 = vmul.f32 1.442695, %v356_v47 }
 0x3f9   :  { %v386_v51 = vpop.xlane.xlu1 %385  ;;  %v355_v53 = vpop.xlane.xlu0 %354 }
 0x3fa   :  { %1786 = vpow2.f32 %v389_v48  ;;  %v388_v55 = vsub.f32 %v2126_v24, %v386_v51  ;;  %v357_v2 = vsub.f32 %v2126_v24, %v355_v53 }
 0x3fb   :  { %1788 = vpow2.f32 %v358_v49 }
 0x3fc   :  { %v391_v57 = vmul.f32 1.442695, %v388_v55  ;;  %v360_v5 = vmul.f32 1.442695, %v357_v2 }
 0x3fd   :  { %v417_v60 = vpop.xlane.xlu1 %416  ;;  %v414_v61 = vpop.xlane.xlu0 %413 }
 0x3fe   :  { %1790 = vpow2.f32 %v391_v57  ;;  %v419_v62 = vsub.f32 %v2126_v24, %v417_v60  ;;  %v418_v63 = vsub.f32 %v2123_v21, %v414_v61 }
 0x400   :  { %v422_v3 = vmul.f32 1.442695, %v419_v62  ;;  %v420_v4 = vmul.f32 1.442695, %v418_v63 }
 0x401   :  { %v329_v15 = vpop.xlane.xlu0 %328  ;;  %v332_v22 = vpop.xlane.xlu1 %331 }
 0x402   :  { %1792 = vpow2.f32 %v422_v3  ;;  %v333_v16 = vsub.f32 %v2123_v21, %v329_v15  ;;  %v334_v32 = vsub.f32 %v2126_v24, %v332_v22 }
 0x403   :  { %1794 = vpow2.f32 %v420_v4 }
 0x404   :  { %v2150_v6 = vpop.eup %1786  ;;  %1796 = vpow2.f32 %v360_v5  ;;  %v335_v17 = vmul.f32 1.442695, %v333_v16  ;;  %v337_v34 = vmul.f32 1.442695, %v334_v32 }
 0x405   :  { %v2152_v8 = vpop.eup %1788  ;;  %395 = vrot.lane.b32.xlu1 %v2150_v6, %s1884_s8 }
 0x406   :  { %364 = vrot.lane.b32.xlu0 %v2152_v8, %s1887_s11  ;;  %1798 = vpow2.f32 %v335_v17 }
 0x407   :  { %1800 = vpow2.f32 %v337_v34 }
 0x408   :  { %v2158_v9 = vpop.eup %1790 }
 0x40a   :  { %397 = vrot.lane.b32.xlu0 %v2158_v9, %s1884_s8 }
 0x40c   :  { %v2162_v10 = vpop.eup %1792 }
 0x40d   :  { %v2164_v13 = vpop.eup %1794 }
 0x40e   :  { %428 = vrot.lane.b32.xlu0 %v2162_v10, %s1888_s23  ;;  %426 = vrot.lane.b32.xlu1 %v2164_v13, %s1888_s23  ;;  %v2170_v14 = vpop.eup %1796 }
 0x410   :  { %v2183_v19 = vpop.eup %1798 }
 0x411   :  { %v1801_v35 = vpop.eup %1800 }
 0x412   :  { %243 = vrot.lane.b32.xlu0 %v2040_v37, %s1889_s24  ;;  %366 = vrot.lane.b32.xlu1 %v2170_v14, %s1887_s11  ;;  %v339_v37 = vsel %vm326_vm5, %v2183_v19, 0.0  ;;  %v342_v43 = vsel %vm326_vm5, %v1801_v35, 0.0 }
 0x416   :  { %247 = vrot.lane.b32.xlu0 %v2054_v39, %s1889_s24  ;;  %241 = vrot.lane.b32.xlu1 %v2031_v36, %s1889_s24 }
 0x41a   :  { %245 = vrot.lane.b32.xlu1 %v2047_v38, %s1889_s24 }
 0x43e   :  { %340 = vadd.xlane.f32.xlu1 %v339_v37 }
 0x477   :  { %v396_v39 = vpop.permute.xlu1 %395 }
 0x478   :  { %v365_v23 = vpop.permute.xlu0 %364  ;;  %v401_v47 = vsel %vm326_vm5, %v396_v39, 0.0 }
 0x479   :  { %v370_v45 = vsel %vm326_vm5, %v365_v23, 0.0 }
 0x47c   :  { %v398_v25 = vpop.permute.xlu0 %397 }
 0x47d   :  { %v404_v46 = vsel %vm326_vm5, %v398_v25, 0.0 }
 0x480   :  { %v429_v26 = vpop.permute.xlu0 %428  ;;  %v427_v36 = vpop.permute.xlu1 %426 }
 0x481   :  { %v435_v24 = vsel %vm326_vm5, %v429_v26, 0.0  ;;  %v432_v48 = vsel %vm326_vm5, %v427_v36, 0.0 }
 0x484   :  { %v2187_v28 = vpop.permute.xlu0 %243  ;;  %v367_v38 = vpop.permute.xlu1 %366 }
 0x485   :  { %v254_v21 = vmul.bf16 %v2187_v28, %v2023_v33  ;;  %v373_v44 = vsel %vm326_vm5, %v367_v38, 0.0 }
 0x487   :  { %456 = vrot.lane.b32.xlu1 %v254_v21, %s1889_s24 }
 0x488   :  { %v2192_v29 = vpop.permute.xlu1 %241  ;;  %v2210_v53 = vpop.permute.xlu0 %247 }
 0x489   :  { %v253_v31 = vmul.bf16 %v2192_v29, %v2023_v33  ;;  %v256_v55 = vmul.bf16 %v2210_v53, %v2023_v33 }
 0x48b   :  { %454 = vrot.lane.b32.xlu0 %v253_v31, %s1889_s24 }
 0x48c   :  { %v2205_v49 = vpop.permute.xlu1 %245 }
 0x48d   :  { %v255_v51 = vmul.bf16 %v2205_v49, %v2023_v33 }
 0x4aa   :  { %343 = vadd.xlane.f32.xlu0 %v342_v43 }
 0x4ab   :  { %374 = vadd.xlane.f32.xlu1 %v373_v44 }
 0x4ae   :  { %371 = vadd.xlane.f32.xlu0 %v370_v45 }
 0x4af   :  { %405 = vadd.xlane.f32.xlu1 %v404_v46 }
 0x4b2   :  { %402 = vadd.xlane.f32.xlu0 %v401_v47 }
 0x4b3   :  { %436 = vadd.xlane.f32.xlu1 %v435_v24 }
 0x4b6   :  { %433 = vadd.xlane.f32.xlu0 %v432_v48 }
 0x4c4   :  { %458 = vrot.lane.b32.xlu1 %v255_v51, %s1889_s24 }
 0x4cb   :  { %v341_v57 = vpop.xlane.xlu1 %340 }
 0x4cc   :  { %460 = vrot.lane.b32.xlu0 %v256_v55, %s1889_s24  ;;  %1802 = vrcp.f32 %v341_v57 }
 0x4d6   :  { %v1803_v16 = vpop.eup %1802 }
 0x4d7   :  { %v347_v34 = vmul.f32 %v1803_v16, %v2183_v19  ;;  %v1757_v16 = vld [vmem:[%s2542_s3 + $0x14] ss:$8 sps:$4 sm:$0xff]  }
 0x4f9   :  { %v457_v61 = vpop.permute.xlu1 %456 }
 0x4fd   :  { %v455_v60 = vpop.permute.xlu0 %454 }
 0x4fe   :  { %1649 = vmatpush3.bf16.msra.mxu0 %v455_v60 }
 0x4ff   :  { %1650 = vmatprep.subr.bf16.mxu0 %v1885_v41 }
 0x502   :  { %1651 = vmatpush3.bf16.msra.mxu0 %v457_v61 }
 0x503   :  { %1652 = vmatprep.subr.bf16.mxu0 %v1885_v41 }
 0x537   :  { %v344_v62 = vpop.xlane.xlu0 %343 }
 0x538   :  { %v375_v63 = vpop.xlane.xlu1 %374  ;;  %1804 = vrcp.f32 %v344_v62 }
 0x539   :  { %1806 = vrcp.f32 %v375_v63 }
 0x53b   :  { %v372_v2 = vpop.xlane.xlu0 %371 }
 0x53c   :  { %v406_v3 = vpop.xlane.xlu1 %405  ;;  %1808 = vrcp.f32 %v372_v2 }
 0x53d   :  { %1810 = vrcp.f32 %v406_v3 }
 0x53f   :  { %v403_v33 = vpop.xlane.xlu0 %402 }
 0x540   :  { %1812 = vrcp.f32 %v403_v33  ;;  %v437_v4 = vpop.xlane.xlu1 %436 }
 0x541   :  { %1814 = vrcp.f32 %v437_v4 }
 0x542   :  { %v1805_v17 = vpop.eup %1804 }
 0x543   :  { %v434_v5 = vpop.xlane.xlu0 %433  ;;  %v1807_v37 = vpop.eup %1806  ;;  %v348_v36 = vmul.f32 %v1805_v17, %v1801_v35 }
 0x544   :  { %1816 = vrcp.f32 %v434_v5  ;;  %v459_v15 = vpop.permute.xlu1 %458  ;;  %v379_v38 = vmul.f32 %v1807_v37, %v2170_v14 }
 0x545   :  { %1653 = vmatpush3.bf16.msra.mxu0 %v459_v15  ;;  %v1755_v15 = vld [vmem:[%s2542_s3 + $0x10] ss:$8 sps:$4 sm:$0xff]  }
 0x546   :  { %1654 = vmatprep.subr.bf16.mxu0 %v1885_v41  ;;  %v1809_v23 = vpop.eup %1808  ;;  %v443_v45 = vsel %vm326_vm5, %v348_v36, %v379_v38 }
 0x547   :  { %v461_v22 = vpop.permute.xlu0 %460  ;;  %v1811_v39 = vpop.eup %1810  ;;  %v378_v21 = vmul.f32 %v1809_v23, %v2152_v8 }
 0x548   :  { %v410_v31 = vmul.f32 %v1811_v39, %v2158_v9 }
 0x549   :  { %1655 = vmatpush3.bf16.msra.mxu0 %v461_v22  ;;  %v442_v46 = vsel %vm326_vm5, %v347_v34, %v378_v21  ;;  %v1534_v21 = vld [vmem:[%s2543_s6] ss:$0 sm:$0xff] }
 0x54a   :  { %v1813_v25 = vpop.eup %1812  ;;  %1660 = vmatprep.subr.bf16.mxu0 %v1885_v41  ;;  %v445_v8 = vsel %vm64_vm0, %v443_v45, %v410_v31  ;;  %v1759_v45 = vld [vmem:[%s2544_s4 + $0x8] sm:$0xff]  }
 0x54b   :  { %v1815_v26 = vpop.eup %1814  ;;  %v409_v32 = vmul.f32 %v1813_v25, %v2150_v6 }
 0x54c   :  { %v441_v43 = vmul.f32 %v1815_v26, %v2162_v10  ;;  %v1750_v10 = vld [vmem:[%s2541_s2] sm:$0xff]  }
 0x54d   :  { %v444_v14 = vsel %vm64_vm0, %v442_v46, %v409_v32 }
 0x54e   :  { %v1817_v44 = vpop.eup %1816  ;;  %v448_v6 = vsel %vm446_vm6, %v445_v8, %v441_v43 }
 0x54f   :  { %v440_v35 = vmul.f32 %v1817_v44, %v2164_v13  ;;  %v1751_v13 = vld [vmem:[%s2541_s2 + $0x8] sm:$0xff]   ;;  %v1758_v44 = vld [vmem:[%s2544_s4] sm:$0xff]  }
 0x550   :  { %1669 = vmatpush3.bf16.msra.mxu1 %v1758_v44 }
 0x551   :  { %v447_v9 = vsel %vm446_vm6, %v444_v14, %v440_v35  ;;  %1670 = vmatprep.subr.bf16.mxu1 %v1885_v41 }
 0x552   :  { %v449_v19 = vpack.c.bf16 %v448_v6, %v447_v9 }
 0x554   :  { %1657 = vmatmul.mubr.msk.bf16.vlgmr.msra.gmra.mrb[4].mxu0 %vm466_vm7, %v449_v19  ;;  %1671 = vmatpush3.bf16.msra.mxu1 %v1759_v45 }
 0x555   :  { %1661 = vmatpush3.bf16.msra.mxu0 %v1750_v10  ;;  %1664 = vmatprep.mubr.msk.bf16.mxu0 %vm1886_vm1, %v1885_v41 }
 0x556   :  { %1662 = vmatprep.subr.bf16.mxu0 %v1885_v41  ;;  %1672 = vmatprep.subr.bf16.mxu1 %v1885_v41 }
 0x559   :  { %1663 = vmatpush3.bf16.msra.mxu0 %v1751_v13 }
 0x627   :  { %v504_v47 = vpop.f32.mrb[4].mxu0 }
 0x628   :  { %v1658_v24 = vpop.f32.mrb[5].mxu0 }
 0x629   :  { %v507_v48 = vpop.f32.mrb[6].mxu0 }
 0x62a   :  { %v511_v51 = vpack.c.bf16 %v507_v48, %v504_v47  ;;  %v1659_v55 = vpop.f32.mrb[7].mxu0  ;;  %v1760_v47 = vld [vmem:[%s2544_s4 + $0x10] sm:$0xff]   ;;  %v1761_v48 = vld [vmem:[%s2544_s4 + $0x18] sm:$0xff]  }
 0x62b   :  { %1673 = vmatpush3.bf16.msra.mxu1 %v1760_v47 }
 0x62c   :  { %1665 = vmatmul.mubr.msk.bf16.vlgmr.msra.gmra.mrb[8].mxu0 %vm64_vm0, %v511_v51  ;;  %1674 = vmatprep.subr.bf16.mxu1 %v1885_v41 }
 0x62d   :  { %659 = vmatprep.mubr.bf16.mxu0 %v1882_v7 }
 0x62f   :  { %1675 = vmatpush3.bf16.msra.mxu1 %v1761_v48 }
 0x630   :  { %1692 = vmatprep.subr.bf16.mxu1 %v1885_v41 }
 0x6ff   :  { %v565_v57 = vpop.f32.mrb[8].mxu0 }
 0x700   :  { %v2245_v60 = vadd.f32 %v565_v57, %v1963_v0  ;;  %v1666_v61 = vpop.f32.mrb[9].mxu0  ;;  %v1754_v0 = vld [vmem:[%s2542_s3 + $0x4] ss:$8 sps:$4 sm:$0xff]  }
 0x701   :  { %v568_v62 = vpop.f32.mrb[10].mxu0  ;;  %627 = vmatprep.subr.bf16.mxu0 %v1754_v0 }
 0x702   :  { %v2248_v63 = vadd.f32 %v568_v62, %v1968_v1  ;;  %v1667_v2 = vpop.f32.mrb[11].mxu0  ;;  %v575_v3 = vmul.f32 %v2245_v60, %v2245_v60  ;;  %v1752_v1 = vld [vmem:[%s2542_s3] ss:$8 sps:$4 sm:$0xff]  }
 0x703   :  { %628 = vmatpush1.bf16.msra.mxu0 %v1752_v1 }
 0x704   :  { %v577_v33 = vsel %vm64_vm0, %v575_v3, 0.0  ;;  %v576_v4 = vmul.f32 %v2248_v63, %v2248_v63  ;;  %629 = vmatprep.subr.bf16.mxu0 %v1757_v16 }
 0x705   :  { %578 = vadd.xlane.f32.xlu1 %v577_v33 }
 0x706   :  { %v580_v5 = vsel %vm64_vm0, %v576_v4, 0.0 }
 0x707   :  { %581 = vadd.xlane.f32.xlu0 %v580_v5  ;;  %630 = vmatpush1.bf16.msra.mxu0 %v1755_v15 }
 0x792   :  { %v579_v17 = vpop.xlane.xlu1 %578 }
 0x793   :  { %v583_v37 = vmul.f32 0.03125, %v579_v17 }
 0x794   :  { %v582_v22 = vpop.xlane.xlu0 %581 }
 0x795   :  { %v585_v23 = vadd.f32 1.1920929e-07, %v583_v37  ;;  %v584_v39 = vmul.f32 0.03125, %v582_v22 }
 0x797   :  { %1818 = vrsqrt.f32 %v585_v23  ;;  %v586_v25 = vadd.f32 1.1920929e-07, %v584_v39 }
 0x799   :  { %1820 = vrsqrt.f32 %v586_v25 }
 0x7a1   :  { %v1819_v26 = vpop.eup %1818 }
 0x7a2   :  { %v589_v36 = vmul.f32 %v1819_v26, %v2245_v60 }
 0x7a3   :  { %v1821_v38 = vpop.eup %1820 }
 0x7a4   :  { %v590_v31 = vmul.f32 %v1821_v38, %v2248_v63  ;;  %v597_v32 = vmul.f32 %v1534_v21, %v589_v36  ;;  %v1765_v36 = vld [vmem:[%s2535_s1 + $0x30] ss:$8 sps:$4 sm:$0xff]   ;;  %v1767_v38 = vld [vmem:[%s2535_s1 + $0x34] ss:$8 sps:$4 sm:$0xff]  }
 0x7a6   :  { %v598_v34 = vmul.f32 %v1534_v21, %v590_v31 }
 0x7a8   :  { %v599_v43 = vpack.c.bf16 %v598_v34, %v597_v32 }
 0x7aa   :  { %1539 = vmatmul.mubr.msk.bf16.vlgmr.msra.gmra.mrb[12].mxu0 %vm64_vm0, %v599_v43 }
 0x7ab   :  { %862 = vmatprep.mubr.bf16.mxu0 %v1882_v7 }
 0x87d   :  { %v661_v46 = vpop.f32.mrb[12].mxu0 }
 0x87e   :  { %v1540_v35 = vmul.f32 -1.442695, %v661_v46  ;;  %v663_v14 = vpop.f32.mrb[13].mxu0 }
 0x87f   :  { %v665_v8 = vpop.f32.mrb[14].mxu0 }
 0x880   :  { %1822 = vpow2.f32 %v1540_v35  ;;  %v1541_v9 = vmul.f32 -1.442695, %v665_v8  ;;  %v667_v6 = vpop.f32.mrb[15].mxu0 }
 0x882   :  { %1824 = vpow2.f32 %v1541_v9 }
 0x88a   :  { %v1823_v10 = vpop.eup %1822 }
 0x88b   :  { %v676_v19 = vadd.f32 1.0, %v1823_v10 }
 0x88c   :  { %v1825_v13 = vpop.eup %1824 }
 0x88d   :  { %1826 = vrcp.f32 %v676_v19  ;;  %v677_v24 = vadd.f32 1.0, %v1825_v13 }
 0x88f   :  { %1828 = vrcp.f32 %v677_v24 }
 0x897   :  { %v1827_v51 = vpop.eup %1826 }
 0x898   :  { %v682_v55 = vmul.f32 %v1827_v51, %v661_v46 }
 0x899   :  { %v1829_v57 = vpop.eup %1828 }
 0x89a   :  { %v683_v61 = vmul.f32 %v1829_v57, %v665_v8  ;;  %686 = vrot.lane.b32.xlu0 %v682_v55, %s1889_s24 }
 0x89c   :  { %688 = vrot.lane.b32.xlu1 %v683_v61, %s1889_s24 }
 0x90c   :  { %v687_v62 = vpop.permute.xlu0 %686 }
 0x90d   :  { %v692_v2 = vmul.f32 %v687_v62, %v661_v46 }
 0x90e   :  { %v689_v3 = vpop.permute.xlu1 %688 }
 0x90f   :  { %v694_v33 = vmul.f32 %v692_v2, %v663_v14  ;;  %v693_v4 = vmul.f32 %v689_v3, %v665_v8  ;;  %v1548_v14 = vld [vmem:[%s2537_s5 + $0x1] ss:$0 sm:$0xff] }
 0x911   :  { %v695_v5 = vmul.f32 %v693_v4, %v667_v6 }
 0x913   :  { %v696_v0 = vpack.c.bf16 %v695_v5, %v694_v33 }
 0x915   :  { %1677 = vmatmul.mubr.msk.bf16.vlgmr.msra.gmra.mrb[4].mxu1 %vm466_vm7, %v696_v0 }
 0x916   :  { %1700 = vmatprep.mubr.msk.bf16.mxu1 %vm1886_vm1, %v1885_v41 }
 0x9e8   :  { %v766_v1 = vpop.f32.mrb[4].mxu1 }
 0x9e9   :  { %v2297_v15 = vadd.f32 %v766_v1, %v2245_v60  ;;  %v1678_v16 = vpop.f32.mrb[5].mxu1  ;;  %v1764_v60 = vld [vmem:[%s2535_s1 + $0x24] ss:$8 sps:$4 sm:$0xff]  }
 0x9ea   :  { %v769_v17 = vpop.f32.mrb[6].mxu1  ;;  %830 = vmatprep.subr.bf16.mxu0 %v1764_v60 }
 0x9eb   :  { %v2300_v37 = vadd.f32 %v769_v17, %v2248_v63  ;;  %v1679_v22 = vpop.f32.mrb[7].mxu1  ;;  %v777_v23 = vmul.f32 %v2297_v15, %v2297_v15  ;;  %v1762_v63 = vld [vmem:[%s2535_s1 + $0x20] ss:$8 sps:$4 sm:$0xff]  }
 0x9ec   :  { %831 = vmatpush1.bf16.msra.mxu0 %v1762_v63 }
 0x9ed   :  { %v779_v39 = vsel %vm64_vm0, %v777_v23, 0.0  ;;  %v778_v25 = vmul.f32 %v2300_v37, %v2300_v37  ;;  %832 = vmatprep.subr.bf16.mxu0 %v1767_v38 }
 0x9ee   :  { %780 = vadd.xlane.f32.xlu1 %v779_v39 }
 0x9ef   :  { %v782_v26 = vsel %vm64_vm0, %v778_v25, 0.0 }
 0x9f0   :  { %783 = vadd.xlane.f32.xlu0 %v782_v26  ;;  %833 = vmatpush1.bf16.msra.mxu0 %v1765_v36 }
 0x9f1   :  { %1680 = vmatprep.subr.bf16.mxu0 %v1885_v41 }
 0xa7b   :  { %v781_v21 = vpop.xlane.xlu1 %780 }
 0xa7c   :  { %v785_v31 = vmul.f32 0.03125, %v781_v21 }
 0xa7d   :  { %v784_v32 = vpop.xlane.xlu0 %783 }
 0xa7e   :  { %v787_v34 = vadd.f32 1.1920929e-07, %v785_v31  ;;  %v786_v43 = vmul.f32 0.03125, %v784_v32 }
 0xa80   :  { %1830 = vrsqrt.f32 %v787_v34  ;;  %v788_v44 = vadd.f32 1.1920929e-07, %v786_v43 }
 0xa82   :  { %1832 = vrsqrt.f32 %v788_v44 }
 0xa8a   :  { %v1831_v45 = vpop.eup %1830 }
 0xa8b   :  { %v791_v46 = vmul.f32 %v1831_v45, %v2297_v15 }
 0xa8c   :  { %v1833_v35 = vpop.eup %1832 }
 0xa8d   :  { %v792_v8 = vmul.f32 %v1833_v35, %v2300_v37  ;;  %v799_v9 = vmul.f32 %v1548_v14, %v791_v46 }
 0xa8f   :  { %v800_v6 = vmul.f32 %v1548_v14, %v792_v8 }
 0xa91   :  { %v801_v10 = vpack.c.bf16 %v800_v6, %v799_v9 }
 0xa93   :  { %1557 = vmatmul.mubr.msk.bf16.vlgmr.msra.gmra.mrb[16].mxu0 %vm64_vm0, %v801_v10 }
 0xa94   :  { %1688 = vmatprep.mubr.msk.bf16.mxu0 %vm1886_vm1, %v1885_v41 }
 0xb66   :  { %v864_v19 = vpop.f32.mrb[16].mxu0 }
 0xb67   :  { %v866_v13 = vpop.f32.mrb[17].mxu0  ;;  %v887_v61 = vmul.f32 %v864_v19, %v2060_v40  ;;  %v873_v17 = vmul.f32 %v864_v19, %v1992_v11 }
 0xb68   :  { %v889_v47 = vmul.f32 %v866_v13, %v2012_v27  ;;  %v868_v24 = vpop.f32.mrb[18].mxu0 }
 0xb69   :  { %v2330_v48 = vpack.c.bf16 %v868_v24, %v864_v19  ;;  %v870_v51 = vpop.f32.mrb[19].mxu0  ;;  %v888_v62 = vmul.f32 %v868_v24, %v2064_v42  ;;  %v876_v40 = vmul.f32 %v868_v24, %v2084_v58  ;;  %v875_v42 = vmul.f32 %v864_v19, %v2087_v59 }
 0xb6a   :  { %v890_v55 = vmul.f32 %v870_v51, %v2019_v30  ;;  %893 = vrot.lane.b32.xlu0 %v889_v47, %s1883_s21  ;;  %v874_v16 = vmul.f32 %v868_v24, %v1999_v12 }
 0xb6c   :  { %895 = vrot.lane.b32.xlu1 %v890_v55, %s1883_s21 }
 0xbdc   :  { %v894_v57 = vpop.permute.xlu0 %893 }
 0xbdd   :  { %v899_v3 = vadd.f32 %v894_v57, %v887_v61 }
 0xbde   :  { %v896_v2 = vpop.permute.xlu1 %895 }
 0xbdf   :  { %v900_v33 = vadd.f32 %v896_v2, %v888_v62 }
 0xbe1   :  { %v901_v4 = vpack.c.bf16 %v900_v33, %v899_v3 }
 0xbe3   :  { %v903_v27 = vmul.bf16 %v901_v4, %v2073_v52  ;;  %v902_v5 = vmul.bf16 %v901_v4, %v2069_v50  ;;  %v905_v30 = vmul.bf16 %v901_v4, %v2081_v56  ;;  %v904_v0 = vmul.bf16 %v901_v4, %v2077_v54 }
 0xbe5   :  { %918 = vrot.lane.b32.xlu0 %v903_v27, %s1884_s8  ;;  %916 = vrot.lane.b32.xlu1 %v902_v5, %s1884_s8 }
 0xbe9   :  { %922 = vrot.lane.b32.xlu0 %v905_v30, %s1884_s8  ;;  %920 = vrot.lane.b32.xlu1 %v904_v0, %s1884_s8  ;;  %v907_v0 = vmul.bf16 %v2330_v48, %v2192_v29 }
 0xbed   :  { %881 = vrot.lane.b32.xlu0 %v876_v40, %s1883_s21  ;;  %879 = vrot.lane.b32.xlu1 %v875_v42, %s1883_s21 }
 0xc57   :  { %v919_v50 = vpop.permute.xlu0 %918  ;;  %v917_v52 = vpop.permute.xlu1 %916 }
 0xc58   :  { %v928_v1 = vsel %vm64_vm0, %v917_v52, 0  ;;  %v931_v59 = vsel %vm64_vm0, %v919_v50, 0 }
 0xc59   :  { %1681 = vmatpush3.bf16.xpose.msra.mxu0 %v928_v1 }
 0xc5a   :  { %1682 = vmatprep.subr.bf16.mxu0 %v1885_v41 }
 0xc5b   :  { %v923_v54 = vpop.permute.xlu0 %922  ;;  %v921_v56 = vpop.permute.xlu1 %920 }
 0xc5c   :  { %v934_v26 = vsel %vm64_vm0, %v921_v56, 0  ;;  %v937_v60 = vsel %vm64_vm0, %v923_v54, 0 }
 0xc5f   :  { %v882_v58 = vpop.permute.xlu0 %881  ;;  %v880_v22 = vpop.permute.xlu1 %879 }
 0xc60   :  { %v886_v23 = vadd.f32 %v882_v58, %v874_v16  ;;  %v885_v39 = vadd.f32 %v880_v22, %v873_v17  ;;  %v908_v22 = vmul.bf16 %v2330_v48, %v2187_v28 }
 0xc61   :  { %1683 = vmatpush3.bf16.xpose.msra.mxu0 %v931_v59 }
 0xc62   :  { %v911_v25 = vpack.c.bf16 %v886_v23, %v885_v39  ;;  %1684 = vmatprep.subr.bf16.mxu0 %v1885_v41 }
 0xc69   :  { %1685 = vmatpush3.bf16.xpose.msra.mxu0 %v934_v26 }
 0xc6a   :  { %1686 = vmatprep.subr.bf16.mxu0 %v1885_v41 }
 0xc71   :  { %1687 = vmatpush3.bf16.xpose.msra.mxu0 %v937_v60 }
 0xc72   :  { %1712 = vmatprep.subr.bf16.mxu0 %v1885_v41 }
 0xc78   :  { %1689 = vmatmul.mubr.msk.bf16.vlgmr.msra.gmra.mrb[20].mxu0 %vm64_vm0, %v911_v25 }
 0xc79   :  { %1720 = vmatprep.mubr.msk.bf16.mxu0 %vm1886_vm1, %v1885_v41 }
 0xd4b   :  { %v973_v11 = vpop.f32.mrb[20].mxu0 }
 0xd4c   :  { %v2363_v12 = vadd.f32 %v973_v11, %v2115_v18  ;;  %v1690_v63 = vpop.f32.mrb[21].mxu0 }
 0xd4d   :  { %v976_v36 = vpop.f32.mrb[22].mxu0 }
 0xd4e   :  { %v977_v38 = vadd.f32 %v976_v36, %v2120_v20  ;;  %v1691_v21 = vpop.f32.mrb[23].mxu0  ;;  %v1032_v31 = vsel %vm380_vm2, %v2363_v12, -inf  ;;  %v1002_v32 = vsel %vm349_vm3, %v2363_v12, -inf  ;;  %v1062_v20 = vsel %vm411_vm4, %v2363_v12, -inf }
 0xd4f   :  { %1033 = vmax.xlane.f32.xlu0 %v1032_v31  ;;  %1003 = vmax.xlane.f32.xlu1 %v1002_v32  ;;  %v980_v44 = vsel %vm326_vm5, %v2363_v12, -inf  ;;  %v910_v31 = vmul.bf16 %v2330_v48, %v2210_v53  ;;  %v909_v32 = vmul.bf16 %v2330_v48, %v2205_v49 }
 0xd50   :  { %v1035_v34 = vsel %vm380_vm2, %v977_v38, -inf  ;;  %v1005_v43 = vsel %vm349_vm3, %v977_v38, -inf  ;;  %v1065_v18 = vsel %vm411_vm4, %v977_v38, -inf  ;;  %v983_v45 = vsel %vm326_vm5, %v977_v38, -inf }
 0xd53   :  { %1036 = vmax.xlane.f32.xlu1 %v1035_v34  ;;  %1006 = vmax.xlane.f32.xlu0 %v1005_v43 }
 0xd57   :  { %1066 = vmax.xlane.f32.xlu1 %v1065_v18  ;;  %1063 = vmax.xlane.f32.xlu0 %v1062_v20 }
 0xd5b   :  { %981 = vmax.xlane.f32.xlu0 %v980_v44  ;;  %984 = vmax.xlane.f32.xlu1 %v983_v45 }
 0xddc   :  { %v1034_v46 = vpop.xlane.xlu0 %1033  ;;  %v1004_v35 = vpop.xlane.xlu1 %1003 }
 0xddd   :  { %v1038_v14 = vsub.f32 %v2363_v12, %v1034_v46  ;;  %v1008_v8 = vsub.f32 %v2363_v12, %v1004_v35 }
 0xddf   :  { %v1040_v9 = vmul.f32 1.442695, %v1038_v14  ;;  %v1010_v6 = vmul.f32 1.442695, %v1008_v8 }
 0xde0   :  { %v1037_v10 = vpop.xlane.xlu1 %1036  ;;  %v1007_v19 = vpop.xlane.xlu0 %1006 }
 0xde1   :  { %1834 = vpow2.f32 %v1040_v9  ;;  %v1039_v13 = vsub.f32 %v977_v38, %v1037_v10  ;;  %v1009_v61 = vsub.f32 %v977_v38, %v1007_v19 }
 0xde2   :  { %1836 = vpow2.f32 %v1010_v6 }
 0xde3   :  { %v1042_v47 = vmul.f32 1.442695, %v1039_v13  ;;  %v1012_v3 = vmul.f32 1.442695, %v1009_v61 }
 0xde4   :  { %v1067_v24 = vpop.xlane.xlu1 %1066  ;;  %v1064_v51 = vpop.xlane.xlu0 %1063 }
 0xde5   :  { %1838 = vpow2.f32 %v1042_v47  ;;  %v1069_v55 = vsub.f32 %v977_v38, %v1067_v24  ;;  %v1068_v57 = vsub.f32 %v2363_v12, %v1064_v51 }
 0xde7   :  { %v1072_v62 = vmul.f32 1.442695, %v1069_v55  ;;  %v1070_v2 = vmul.f32 1.442695, %v1068_v57 }
 0xde8   :  { %v985_v42 = vpop.xlane.xlu1 %984  ;;  %v982_v52 = vpop.xlane.xlu0 %981 }
 0xde9   :  { %1840 = vpow2.f32 %v1072_v62  ;;  %v987_v50 = vsub.f32 %v977_v38, %v985_v42  ;;  %v986_v54 = vsub.f32 %v2363_v12, %v982_v52 }
 0xdea   :  { %1842 = vpow2.f32 %v1070_v2 }
 0xdeb   :  { %v2381_v33 = vpop.eup %1834  ;;  %1844 = vpow2.f32 %v1012_v3  ;;  %v990_v1 = vmul.f32 1.442695, %v987_v50  ;;  %v988_v56 = vmul.f32 1.442695, %v986_v54 }
 0xdec   :  { %v2383_v4 = vpop.eup %1836  ;;  %1046 = vrot.lane.b32.xlu1 %v2381_v33, %s1884_s8 }
 0xded   :  { %1016 = vrot.lane.b32.xlu0 %v2383_v4, %s1887_s11  ;;  %1846 = vpow2.f32 %v990_v1 }
 0xdee   :  { %1848 = vpow2.f32 %v988_v56 }
 0xdef   :  { %v2389_v27 = vpop.eup %1838 }
 0xdf1   :  { %1048 = vrot.lane.b32.xlu0 %v2389_v27, %s1884_s8 }
 0xdf3   :  { %v2393_v5 = vpop.eup %1840 }
 0xdf4   :  { %v2395_v30 = vpop.eup %1842 }
 0xdf5   :  { %1078 = vrot.lane.b32.xlu0 %v2393_v5, %s1888_s23  ;;  %1076 = vrot.lane.b32.xlu1 %v2395_v30, %s1888_s23  ;;  %v2403_v40 = vpop.eup %1844 }
 0xdf7   :  { %v2409_v16 = vpop.eup %1846 }
 0xdf8   :  { %v995_v29 = vsel %vm326_vm5, %v2409_v16, 0.0  ;;  %v2413_v17 = vpop.eup %1848 }
 0xdf9   :  { %1103 = vrot.lane.b32.xlu0 %v907_v0, %s1889_s24  ;;  %1018 = vrot.lane.b32.xlu1 %v2403_v40, %s1887_s11  ;;  %v992_v58 = vsel %vm326_vm5, %v2413_v17, 0.0 }
 0xe18   :  { %996 = vadd.xlane.f32.xlu0 %v995_v29 }
 0xe1d   :  { %993 = vadd.xlane.f32.xlu1 %v992_v58 }
 0xe2e   :  { %1105 = vrot.lane.b32.xlu1 %v908_v22, %s1889_s24 }
 0xe5e   :  { %v1047_v39 = vpop.permute.xlu1 %1046 }
 0xe5f   :  { %v1017_v59 = vpop.permute.xlu0 %1016  ;;  %v1052_v26 = vsel %vm326_vm5, %v1047_v39, 0.0 }
 0xe60   :  { %v1022_v23 = vsel %vm326_vm5, %v1017_v59, 0.0 }
 0xe61   :  { %1023 = vadd.xlane.f32.xlu0 %v1022_v23 }
 0xe63   :  { %v1049_v25 = vpop.permute.xlu0 %1048 }
 0xe64   :  { %v1055_v38 = vsel %vm326_vm5, %v1049_v25, 0.0 }
 0xe65   :  { %1053 = vadd.xlane.f32.xlu0 %v1052_v26 }
 0xe67   :  { %v1079_v60 = vpop.permute.xlu0 %1078  ;;  %v1077_v11 = vpop.permute.xlu1 %1076 }
 0xe68   :  { %v1082_v12 = vsel %vm326_vm5, %v1077_v11, 0.0  ;;  %v1085_v21 = vsel %vm326_vm5, %v1079_v60, 0.0  ;;  %v1773_v60 = vld [vmem:[%s2542_s3 + $0x30] ss:$8 sps:$4 sm:$0xff]   ;;  %v1775_v11 = vld [vmem:[%s2542_s3 + $0x34] ss:$8 sps:$4 sm:$0xff]  }
 0xe69   :  { %1083 = vadd.xlane.f32.xlu0 %v1082_v12 }
 0xe6b   :  { %v1104_v63 = vpop.permute.xlu0 %1103  ;;  %v1019_v36 = vpop.permute.xlu1 %1018 }
 0xe6c   :  { %1693 = vmatpush3.bf16.msra.mxu1 %v1104_v63  ;;  %v1025_v28 = vsel %vm326_vm5, %v1019_v36, 0.0 }
 0xe6d   :  { %1026 = vadd.xlane.f32.xlu1 %v1025_v28  ;;  %1694 = vmatprep.subr.bf16.mxu1 %v1885_v41 }
 0xe71   :  { %1056 = vadd.xlane.f32.xlu1 %v1055_v38 }
 0xe75   :  { %1086 = vadd.xlane.f32.xlu1 %v1085_v21 }
 0xe7f   :  { %1109 = vrot.lane.b32.xlu0 %v910_v31, %s1889_s24 }
 0xe86   :  { %1107 = vrot.lane.b32.xlu1 %v909_v32, %s1889_s24 }
 0xea5   :  { %v997_v18 = vpop.xlane.xlu0 %996 }
 0xea6   :  { %1850 = vrcp.f32 %v997_v18 }
 0xeaa   :  { %v994_v34 = vpop.xlane.xlu1 %993 }
 0xeab   :  { %1852 = vrcp.f32 %v994_v34 }
 0xeae   :  { %v1106_v43 = vpop.permute.xlu1 %1105 }
 0xeaf   :  { %1695 = vmatpush3.bf16.msra.mxu1 %v1106_v43  ;;  %v1568_v43 = vld [vmem:[%s2543_s6 + $0x1] ss:$0 sm:$0xff] }
 0xeb0   :  { %1696 = vmatprep.subr.bf16.mxu1 %v1885_v41  ;;  %v1851_v48 = vpop.eup %1850 }
 0xeb1   :  { %v1001_v57 = vmul.f32 %v1851_v48, %v2409_v16 }
 0xeb5   :  { %v1853_v35 = vpop.eup %1852 }
 0xeb6   :  { %v1000_v61 = vmul.f32 %v1853_v35, %v2413_v17 }
 0xeee   :  { %v1024_v20 = vpop.xlane.xlu0 %1023 }
 0xeef   :  { %1854 = vrcp.f32 %v1024_v20 }
 0xef2   :  { %v1054_v44 = vpop.xlane.xlu0 %1053 }
 0xef3   :  { %1856 = vrcp.f32 %v1054_v44 }
 0xef6   :  { %v1084_v53 = vpop.xlane.xlu0 %1083 }
 0xef9   :  { %v1855_v14 = vpop.eup %1854 }
 0xefa   :  { %v1027_v45 = vpop.xlane.xlu1 %1026  ;;  %v1030_v13 = vmul.f32 %v1855_v14, %v2383_v4  ;;  %v1110_v47 = vpop.permute.xlu0 %1109 }
 0xefb   :  { %1858 = vrcp.f32 %v1027_v45 }
 0xefc   :  { %1860 = vrcp.f32 %v1084_v53  ;;  %v1092_v3 = vsel %vm326_vm5, %v1000_v61, %v1030_v13  ;;  %v1776_v53 = vld [vmem:[%s2544_s4 + $0x20] sm:$0xff]   ;;  %v1778_v13 = vld [vmem:[%s2544_s4 + $0x30] sm:$0xff]  }
 0xefd   :  { %v1857_v8 = vpop.eup %1856  ;;  %1713 = vmatpush3.bf16.msra.mxu0 %v1776_v53 }
 0xefe   :  { %v1057_v46 = vpop.xlane.xlu1 %1056  ;;  %v1060_v51 = vmul.f32 %v1857_v8, %v2381_v33  ;;  %1714 = vmatprep.subr.bf16.mxu0 %v1885_v41 }
 0xeff   :  { %1862 = vrcp.f32 %v1057_v46  ;;  %v1777_v46 = vld [vmem:[%s2544_s4 + $0x28] sm:$0xff]  }
 0xf00   :  { %v1094_v33 = vsel %vm64_vm0, %v1092_v3, %v1060_v51 }
 0xf01   :  { %1715 = vmatpush3.bf16.msra.mxu0 %v1777_v46 }
 0xf02   :  { %v1087_v49 = vpop.xlane.xlu1 %1086  ;;  %1716 = vmatprep.subr.bf16.mxu0 %v1885_v41 }
 0xf03   :  { %1864 = vrcp.f32 %v1087_v49 }
 0xf05   :  { %v1859_v6 = vpop.eup %1858  ;;  %1717 = vmatpush3.bf16.msra.mxu0 %v1778_v13 }
 0xf06   :  { %v1108_v9 = vpop.permute.xlu1 %1107  ;;  %v1861_v10 = vpop.eup %1860  ;;  %v1031_v24 = vmul.f32 %v1859_v6, %v2403_v40  ;;  %1718 = vmatprep.subr.bf16.mxu0 %v1885_v41 }
 0xf07   :  { %1697 = vmatpush3.bf16.msra.mxu1 %v1108_v9  ;;  %v1090_v62 = vmul.f32 %v1861_v10, %v2395_v30  ;;  %v1768_v30 = vld [vmem:[%s2541_s2 + $0x10] sm:$0xff]  }
 0xf08   :  { %1698 = vmatprep.subr.bf16.mxu1 %v1885_v41  ;;  %v1093_v4 = vsel %vm326_vm5, %v1001_v57, %v1031_v24  ;;  %v1779_v24 = vld [vmem:[%s2544_s4 + $0x38] sm:$0xff]  }
 0xf09   :  { %v1863_v19 = vpop.eup %1862  ;;  %v1096_v40 = vsel %vm446_vm6, %v1094_v33, %v1090_v62  ;;  %1719 = vmatpush3.bf16.msra.mxu0 %v1779_v24 }
 0xf0a   :  { %v1061_v55 = vmul.f32 %v1863_v19, %v2389_v27 }
 0xf0b   :  { %1699 = vmatpush3.bf16.msra.mxu1 %v1110_v47 }
 0xf0c   :  { %1704 = vmatprep.subr.bf16.mxu1 %v1885_v41  ;;  %v1095_v27 = vsel %vm64_vm0, %v1093_v4, %v1061_v55 }
 0xf0d   :  { %v1865_v2 = vpop.eup %1864 }
 0xf0e   :  { %v1091_v0 = vmul.f32 %v1865_v2, %v2393_v5  ;;  %v1769_v5 = vld [vmem:[%s2541_s2 + $0x18] sm:$0xff]  }
 0xf10   :  { %v1097_v42 = vsel %vm446_vm6, %v1095_v27, %v1091_v0 }
 0xf11   :  { %v1098_v50 = vpack.c.bf16 %v1097_v42, %v1096_v40 }
 0xf13   :  { %1701 = vmatmul.mubr.msk.bf16.vlgmr.msra.gmra.mrb[8].mxu1 %vm466_vm7, %v1098_v50 }
 0xf14   :  { %1705 = vmatpush3.bf16.msra.mxu1 %v1768_v30  ;;  %1708 = vmatprep.mubr.msk.bf16.mxu1 %vm1886_vm1, %v1885_v41 }
 0xf15   :  { %1706 = vmatprep.subr.bf16.mxu1 %v1885_v41 }
 0xf18   :  { %1707 = vmatpush3.bf16.msra.mxu1 %v1769_v5 }
 0xfe6   :  { %v1152_v52 = vpop.f32.mrb[8].mxu1 }
 0xfe7   :  { %v1702_v1 = vpop.f32.mrb[9].mxu1 }
 0xfe8   :  { %v1155_v54 = vpop.f32.mrb[10].mxu1 }
 0xfe9   :  { %v1159_v56 = vpack.c.bf16 %v1155_v54, %v1152_v52  ;;  %v1703_v16 = vpop.f32.mrb[11].mxu1 }
 0xfeb   :  { %1709 = vmatmul.mubr.msk.bf16.vlgmr.msra.gmra.mrb[12].mxu1 %vm64_vm0, %v1159_v56 }
 0xfec   :  { %1310 = vmatprep.mubr.bf16.mxu1 %v1882_v7 }
0x10be   :  { %v1214_v29 = vpop.f32.mrb[12].mxu1 }
0x10bf   :  { %v2463_v17 = vadd.f32 %v1214_v29, %v2297_v15  ;;  %v1710_v58 = vpop.f32.mrb[13].mxu1  ;;  %v1772_v15 = vld [vmem:[%s2542_s3 + $0x24] ss:$8 sps:$4 sm:$0xff]  }
0x10c0   :  { %v1217_v22 = vpop.f32.mrb[14].mxu1  ;;  %1278 = vmatprep.subr.bf16.mxu1 %v1772_v15  ;;  %v1780_v29 = vld [vmem:[%s2545_s10] sm:$0xff]  }
0x10c1   :  { %v2466_v59 = vadd.f32 %v1217_v22, %v2300_v37  ;;  %v1711_v23 = vpop.f32.mrb[15].mxu1  ;;  %v1225_v39 = vmul.f32 %v2463_v17, %v2463_v17  ;;  %v1770_v37 = vld [vmem:[%s2542_s3 + $0x20] ss:$8 sps:$4 sm:$0xff]  }
0x10c2   :  { %1279 = vmatpush1.bf16.msra.mxu1 %v1770_v37 }
0x10c3   :  { %v1227_v25 = vsel %vm64_vm0, %v1225_v39, 0.0  ;;  %v1226_v26 = vmul.f32 %v2466_v59, %v2466_v59  ;;  %1280 = vmatprep.subr.bf16.mxu1 %v1775_v11 }
0x10c4   :  { %1228 = vadd.xlane.f32.xlu1 %v1227_v25 }
0x10c5   :  { %v1230_v7 = vsel %vm64_vm0, %v1226_v26, 0.0 }
0x10c6   :  { %1231 = vadd.xlane.f32.xlu0 %v1230_v7  ;;  %1281 = vmatpush1.bf16.msra.mxu1 %v1773_v60 }
0x10c7   :  { %1724 = vmatprep.subr.bf16.mxu1 %v1885_v41 }
0x1151   :  { %v1229_v12 = vpop.xlane.xlu1 %1228 }
0x1152   :  { %v1233_v63 = vmul.f32 0.03125, %v1229_v12 }
0x1153   :  { %v1232_v36 = vpop.xlane.xlu0 %1231 }
0x1154   :  { %v1235_v28 = vadd.f32 1.1920929e-07, %v1233_v63  ;;  %v1234_v38 = vmul.f32 0.03125, %v1232_v36 }
0x1156   :  { %1866 = vrsqrt.f32 %v1235_v28  ;;  %v1236_v21 = vadd.f32 1.1920929e-07, %v1234_v38 }
0x1158   :  { %1868 = vrsqrt.f32 %v1236_v21 }
0x1160   :  { %v1867_v31 = vpop.eup %1866 }
0x1161   :  { %v1239_v32 = vmul.f32 %v1867_v31, %v2463_v17 }
0x1162   :  { %v1869_v34 = vpop.eup %1868 }
0x1163   :  { %v1240_v18 = vmul.f32 %v1869_v34, %v2466_v59  ;;  %v1247_v20 = vmul.f32 %v1568_v43, %v1239_v32 }
0x1165   :  { %v1248_v44 = vmul.f32 %v1568_v43, %v1240_v18 }
0x1167   :  { %v1249_v45 = vpack.c.bf16 %v1248_v44, %v1247_v20 }
0x1169   :  { %1577 = vmatmul.mubr.msk.bf16.vlgmr.msra.gmra.mrb[16].mxu1 %vm64_vm0, %v1249_v45 }
0x116a   :  { %1728 = vmatprep.mubr.msk.bf16.mxu1 %vm1886_vm1, %v1885_v41  ;;  %1725 = vmatpush3.bf16.msra.mxu1 %v1780_v29 }
0x116b   :  { %1726 = vmatprep.subr.bf16.mxu1 %v1885_v41  ;;  %v1593_v41 = vld [vmem:[%s2546_s9] ss:$0 sm:$0xff] }
0x123c   :  { %v1312_v49 = vpop.f32.mrb[16].mxu1 }
0x123d   :  { %v1578_v48 = vmul.f32 -1.442695, %v1312_v49  ;;  %v1314_v35 = vpop.f32.mrb[17].mxu1 }
0x123e   :  { %v1316_v14 = vpop.f32.mrb[18].mxu1 }
0x123f   :  { %1870 = vpow2.f32 %v1578_v48  ;;  %v1579_v8 = vmul.f32 -1.442695, %v1316_v14  ;;  %v1318_v9 = vpop.f32.mrb[19].mxu1 }
0x1241   :  { %1872 = vpow2.f32 %v1579_v8 }
0x1249   :  { %v1871_v6 = vpop.eup %1870 }
0x124a   :  { %v1327_v10 = vadd.f32 1.0, %v1871_v6 }
0x124b   :  { %v1873_v19 = vpop.eup %1872 }
0x124c   :  { %1874 = vrcp.f32 %v1327_v10  ;;  %v1328_v47 = vadd.f32 1.0, %v1873_v19 }
0x124e   :  { %1876 = vrcp.f32 %v1328_v47 }
0x1256   :  { %v1875_v51 = vpop.eup %1874 }
0x1257   :  { %v1333_v55 = vmul.f32 %v1875_v51, %v1312_v49 }
0x1258   :  { %v1877_v57 = vpop.eup %1876 }
0x1259   :  { %v1334_v61 = vmul.f32 %v1877_v57, %v1316_v14  ;;  %1337 = vrot.lane.b32.xlu0 %v1333_v55, %s1889_s24 }
0x125b   :  { %1339 = vrot.lane.b32.xlu1 %v1334_v61, %s1889_s24 }
0x12cb   :  { %v1338_v62 = vpop.permute.xlu0 %1337 }
0x12cc   :  { %v1343_v2 = vmul.f32 %v1338_v62, %v1312_v49 }
0x12cd   :  { %v1340_v3 = vpop.permute.xlu1 %1339 }
0x12ce   :  { %v1345_v4 = vmul.f32 %v1343_v2, %v1314_v35  ;;  %v1344_v0 = vmul.f32 %v1340_v3, %v1316_v14 }
0x12d0   :  { %v1346_v33 = vmul.f32 %v1344_v0, %v1318_v9 }
0x12d2   :  { %v1347_v27 = vpack.c.bf16 %v1346_v33, %v1345_v4 }
0x12d4   :  { %1721 = vmatmul.mubr.msk.bf16.vlgmr.msra.gmra.mrb[24].mxu0 %vm466_vm7, %v1347_v27 }
0x13a7   :  { %v1418_v40 = vpop.f32.mrb[24].mxu0 }
0x13a8   :  { %v1425_v42 = vadd.f32 %v1418_v40, %v2463_v17  ;;  %v1722_v30 = vpop.f32.mrb[25].mxu0  ;;  %v1781_v17 = vld [vmem:[%s2545_s10 + $0x8] sm:$0xff]  }
0x13a9   :  { %v1421_v50 = vpop.f32.mrb[26].mxu0  ;;  %1727 = vmatpush3.bf16.msra.mxu1 %v1781_v17 }
0x13aa   :  { %v1426_v5 = vadd.f32 %v1421_v50, %v2466_v59  ;;  %v1723_v52 = vpop.f32.mrb[27].mxu0  ;;  %v1428_v1 = vmul.f32 %v1425_v42, %v1425_v42 }
0x13ac   :  { %v1430_v54 = vsel %vm64_vm0, %v1428_v1, 0.0  ;;  %v1429_v56 = vmul.f32 %v1426_v5, %v1426_v5 }
0x13ad   :  { %1431 = vadd.xlane.f32.xlu1 %v1430_v54 }
0x13ae   :  { %v1433_v16 = vsel %vm64_vm0, %v1429_v56, 0.0 }
0x13af   :  { %1434 = vadd.xlane.f32.xlu0 %v1433_v16 }
0x143a   :  { %v1432_v58 = vpop.xlane.xlu1 %1431 }
0x143b   :  { %v1436_v22 = vmul.f32 0.03125, %v1432_v58 }
0x143c   :  { %v1435_v59 = vpop.xlane.xlu0 %1434 }
0x143d   :  { %v1438_v23 = vadd.f32 1.1920929e-07, %v1436_v22  ;;  %v1437_v39 = vmul.f32 0.03125, %v1435_v59 }
0x143f   :  { %1878 = vrsqrt.f32 %v1438_v23  ;;  %v1439_v25 = vadd.f32 1.1920929e-07, %v1437_v39 }
0x1441   :  { %1880 = vrsqrt.f32 %v1439_v25 }
0x1449   :  { %v1879_v26 = vpop.eup %1878 }
0x144a   :  { %v1442_v7 = vmul.f32 %v1879_v26, %v1425_v42 }
0x144b   :  { %v1881_v15 = vpop.eup %1880 }
0x144c   :  { %v1443_v37 = vmul.f32 %v1881_v15, %v1426_v5  ;;  %v1450_v60 = vmul.f32 %v1593_v41, %v1442_v7 }
0x144e   :  { %v1451_v11 = vmul.f32 %v1593_v41, %v1443_v37 }
0x1450   :  { %v1452_v12 = vpack.c.bf16 %v1451_v11, %v1450_v60 }
0x1452   :  { %1729 = vmatmul.mubr.msk.bf16.vlgmr.msra.gmra.mrb[20].mxu1 %vm64_vm0, %v1452_v12 }
0x1525   :  { %v1506_v63 = vpop.f32.mrb[20].mxu1 }
0x1526   :  { %1513 = vst [vmem:[%s2547_s13] sm:$0xff] %v1506_v63  ;;  %v1730_v36 = vpop.f32.mrb[21].mxu1 }
0x1527   :  { %v1509_v28 = vpop.f32.mrb[22].mxu1 }
0x1528   :  { %1514 = vst [vmem:[%s2547_s13 + $0x8] sm:$0xff] %v1509_v28  ;;  %v1731_v38 = vpop.f32.mrb[23].mxu1 }

</bundles_post_ra>
